<compile_context>
chip_gen: v6e
topology: v6e:2x2x1
jax: 0.10.0
libtpu: 0.0.40
codegen_flags: <defaults>
</compile_context>

<pallas_src>
import jax
import jax.numpy as jnp
from jax.experimental import pallas as pl
from jax.experimental.pallas import tpu as pltpu


def _bilinear_sim_kernel(x_ref, w_ref, yt_ref, o_ref, acc_ref, xw_ref):
    """One (i, j, k) grid step.

    x_ref  : (tm, E)        row block of x        (changes with i only)
    w_ref  : (E, tk)        column block of w     (streamed only while j == 0)
    yt_ref : (tk, tn)       block of y.T          (changes with j, k)
    o_ref  : (tm, tn)       output tile           (changes with i, j)
    acc_ref: (tm, tn)  f32  accumulator scratch
    xw_ref : (n_k, tm, tk)  x @ w slab for the current i-row block
    """
    j = pl.program_id(1)
    k = pl.program_id(2)
    n_k = pl.num_programs(2)

    # Build this k-column block of (x_i @ w) once per i-row block (at j == 0);
    # it is reused unchanged for every subsequent j tile of the same i.
    @pl.when(j == 0)
    def _compute_xw_block():
        xw = jnp.dot(x_ref[...], w_ref[...],
                     preferred_element_type=jnp.float32)
        xw_ref[k] = xw.astype(xw_ref.dtype)

    @pl.when(k == 0)
    def _init_acc():
        acc_ref[...] = jnp.zeros_like(acc_ref)

    # similarities tile += (x_i @ w)_k @ (y.T)_{k,j}   — plain NN matmul.
    acc_ref[...] += jnp.dot(xw_ref[k], yt_ref[...],
                            preferred_element_type=jnp.float32)

    @pl.when(k == n_k - 1)
    def _writeback():
        o_ref[...] = acc_ref[...].astype(o_ref.dtype)


def _pick_tile(dim: int, preferred: int, align: int) -> int:
    """Largest multiple of `align` <= `preferred` that divides `dim`.

    Falls back to the full dimension (always a legal block shape) when the
    dimension is not `align`-aligned or no aligned divisor exists.
    """
    if dim % align != 0:
        return dim
    t = min(preferred, dim)
    t -= t % align
    while t >= align:
        if dim % t == 0:
            return t
        t -= align
    return dim


def _vmem_capacity_bytes() -> int:
    """Physical VMEM of the attached TPU; conservative fallback if unknown."""
    try:
        cap = int(pltpu.get_tpu_info().vmem_capacity_bytes)
        if cap > 0:
            return cap
    except Exception:
        pass
    return 64 * 2**20  # safe on every current TPU generation (v7x has 64 MiB)


def _vmem_need(tm: int, tn: int, tk: int, E: int, itm: int, out_itm: int) -> int:
    """Resident VMEM footprint for one pipeline steady state."""
    return ((2 * tm * E + 2 * E * tk + 2 * tk * tn) * itm  # double-buffered inputs
            + 2 * tm * tn * out_itm                        # double-buffered output
            + tm * tn * 4                                  # f32 accumulator
            + tm * E * itm)                                # x @ w slab (n_k*tm*tk)


def _plan_tiles(B: int, E: int, itm: int, out_itm: int,
                vmem_cap: int, small_vmem: bool):
    # Sublane packing: 8 for f32, 16 for bf16, 32 for int8.
    sub = max(8, 32 // itm)
    tm_pref = 128 if small_vmem else 512
    if small_vmem and B % sub == 0 and B // 2 >= sub:
        # Keep >= 2 i-blocks so both v7x TensorCores get work (i is "parallel").
        tm_pref = min(tm_pref, B // 2)
    tn_pref = 256  # feed the full 256-wide MXU on v6e/v7x (128 native on v5e)
    tk_pref = 256

    budget = int(0.80 * vmem_cap)
    tm = tn = tk = None
    for _ in range(8):
        tm = _pick_tile(B, tm_pref, sub)     # x / out rows      (sublane)
        tn = _pick_tile(B, tn_pref, 128)     # out lane dim      (lane dense)
        tk = _pick_tile(E, tk_pref, 128)     # E contraction     (lane)
        if _vmem_need(tm, tn, tk, E, itm, out_itm) <= budget:
            break
        if tm > sub and tm_pref > sub:
            tm_pref = max(sub, tm_pref // 2)
        elif tk > 128 and tk_pref > 128:
            tk_pref = max(128, tk_pref // 2)
        elif tn > 128 and tn_pref > 128:
            tn_pref = max(128, tn_pref // 2)
        else:
            break
    return tm, tn, tk


@jax.jit
def bilinear_similarity(x, y, w):
    """Pallas TPU implementation of BilinearSimilarity.forward: x @ w @ y.T."""
    B, E = x.shape
    assert y.shape == (B, E), (y.shape, (B, E))
    assert w.shape == (E, E), (w.shape, (E, E))
    out_dtype = x.dtype
    itm = jnp.dtype(x.dtype).itemsize
    out_itm = jnp.dtype(out_dtype).itemsize

    vmem_cap = _vmem_capacity_bytes()
    small_vmem = vmem_cap <= 80 * 2**20          # v7x-class part (64 MiB)

    tm, tn, tk = _plan_tiles(B, E, itm, out_itm, vmem_cap, small_vmem)
    n_i, n_j, n_k = B // tm, B // tn, E // tk

    need = _vmem_need(tm, tn, tk, E, itm, out_itm)
    vmem_limit = int(min(0.85 * vmem_cap, max(32 * 2**20, 1.5 * need)))

    # One HBM-side transpose, amortized over the whole grid; the kernel then
    # only issues NN matmuls into the MXU.
    y_t = y.T                                     # (E, B)

    flops = 2 * B * E * E + 2 * B * B * E
    bytes_accessed = (B * E * itm                 # x: read once
                      + n_i * E * E * itm         # w: read once per i block
                      + n_i * B * E * itm         # y.T: read once per i block
                      + B * B * out_itm)          # output: written once

    return pl.pallas_call(
        _bilinear_sim_kernel,
        out_shape=jax.ShapeDtypeStruct((B, B), out_dtype),
        grid=(n_i, n_j, n_k),
        in_specs=[
            # x row slab: constant across (j, k) -> DMA'd once per i.
            pl.BlockSpec((tm, E), lambda i, j, k: (i, 0)),
            # w column block: only consumed at j == 0; freeze the block index
            # for j > 0 so Pallas skips the (E, tk) DMA on later (j, k) steps.
            pl.BlockSpec((E, tk),
                         lambda i, j, k: (0, jnp.where(j == 0, k, n_k - 1))),
            # y.T block: plain NN operand of the second matmul.
            pl.BlockSpec((tk, tn), lambda i, j, k: (k, j)),
        ],
        out_specs=pl.BlockSpec((tm, tn), lambda i, j, k: (i, j)),
        scratch_shapes=[
            pltpu.VMEM((tm, tn), jnp.float32),     # f32 accumulator
            pltpu.VMEM((n_k, tm, tk), x.dtype),    # x @ w slab (row block i)
        ],
        compiler_params=pltpu.CompilerParams(
            # i is safe to shard across TensorCores (v7x megacore).  j must
            # stay "arbitrary": the xw slab written at j == 0 is reused at
            # j > 0 and must run on the same core.  k is the reduction axis.
            dimension_semantics=("parallel", "arbitrary", "arbitrary"),
            vmem_limit_bytes=vmem_limit,
        ),
        cost_estimate=pl.CostEstimate(
            flops=flops, transcendentals=0, bytes_accessed=bytes_accessed),
    )(x, w, y_t)


if __name__ == "__main__":
    key = jax.random.PRNGKey(0)
    kx, ky, kw = jax.random.split(key, 3)

    # Primary test: lane/MXU-aligned shape exercising a real multi-step grid
    # (k-accumulation, x@w-slab reuse across j, frozen-w DMA at j > 0).
    B, E = 256, 512
    x = jax.random.normal(kx, (B, E), dtype=jnp.float32)
    y = jax.random.normal(ky, (B, E), dtype=jnp.float32)
    # nn.Parameter(dim, dim).normal_(0, 0.05) -> deterministic init here.
    w = 0.05 * jax.random.normal(kw, (E, E), dtype=jnp.float32)

    out = bilinear_similarity(x, y, w)
    jax.block_until_ready(out)
    ref = x @ (w @ y.T)
    assert out.shape == (B, B)
    assert jnp.allclose(out, ref, atol=1e-3, rtol=1e-3), float(
        jnp.max(jnp.abs(out - ref)))

    # Tiny / unaligned regime (tiles fall back to full extents, grid (1,1,1)).
    Bs, Es = 8, 32
    xs = jax.random.normal(kx, (Bs, Es), dtype=jnp.float32)
    ys = jax.random.normal(ky, (Bs, Es), dtype=jnp.float32)
    ws = 0.05 * jax.random.normal(kw, (Es, Es), dtype=jnp.float32)
    outs = bilinear_similarity(xs, ys, ws)
    jax.block_until_ready(outs)
    refs = xs @ (ws @ ys.T)
    assert outs.shape == (Bs, Bs)
    assert jnp.allclose(outs, refs, atol=1e-4, rtol=1e-4)

    print("KERNEL_OK")
</pallas_src>

<mosaic_0001>
module attributes {stable_mosaic.version = 11 : i64} {
  func.func @_bilinear_sim_kernel(%arg0: i32, %arg1: i32, %arg2: i32, %arg3: memref<128x512xf32, #tpu.memory_space<vmem>>, %arg4: memref<512x256xf32, #tpu.memory_space<vmem>>, %arg5: memref<256x256xf32, #tpu.memory_space<vmem>>, %arg6: memref<128x256xf32, #tpu.memory_space<vmem>>, %arg7: memref<128x256xf32, #tpu.memory_space<vmem>>, %arg8: memref<2x128x256xf32, #tpu.memory_space<vmem>>) attributes {dimension_semantics = [#tpu.dimension_semantics<parallel>, #tpu.dimension_semantics<arbitrary>, #tpu.dimension_semantics<arbitrary>], iteration_bounds = array<i64: 2, 1, 2>, scalar_prefetch = 0 : i64, scratch_operands = 2 : i64, tpu.core_type = #tpu.core_type<tc>, window_params = [{transform_indices = @transform_0, window_bounds = array<i64: 128, 512>}, {transform_indices = @transform_1, window_bounds = array<i64: 512, 256>}, {transform_indices = @transform_2, window_bounds = array<i64: 256, 256>}, {transform_indices = @transform_3, window_bounds = array<i64: 128, 256>}]} {
    %c0_i32 = arith.constant 0 : i32
    %0 = arith.cmpi eq, %arg1, %c0_i32 : i32
    %1 = arith.extui %0 : i1 to i32
    %c0_i32_0 = arith.constant 0 : i32
    %2 = arith.cmpi ne, %1, %c0_i32_0 : i32
    scf.if %2 {
      %c0_11 = arith.constant 0 : index
      %c0_12 = arith.constant 0 : index
      %17 = vector.load %arg3[%c0_11, %c0_12] : memref<128x512xf32, #tpu.memory_space<vmem>>, vector<128x512xf32>
      %c0_13 = arith.constant 0 : index
      %c0_14 = arith.constant 0 : index
      %18 = vector.load %arg4[%c0_13, %c0_14] : memref<512x256xf32, #tpu.memory_space<vmem>>, vector<512x256xf32>
      %cst_15 = arith.constant dense<0.000000e+00> : vector<128x256xf32>
      %19 = tpu.matmul %17, %18, %cst_15 {dimension_numbers = #tpu.dot_dimension_numbers<[1], [0], [0], [1], [0, 0, 1, 1], [], []>} : vector<128x512xf32>, vector<512x256xf32>, vector<128x256xf32> -> vector<128x256xf32>
      %20 = arith.index_cast %arg2 : i32 to index
      %c0_16 = arith.constant 0 : index
      %c0_17 = arith.constant 0 : index
      %21 = vector.load %arg8[%20, %c0_16, %c0_17] : memref<2x128x256xf32, #tpu.memory_space<vmem>>, vector<1x128x256xf32>
      %22 = vector.shape_cast %21 : vector<1x128x256xf32> to vector<128x256xf32>
      %23 = vector.shape_cast %19 : vector<128x256xf32> to vector<1x128x256xf32>
      tpu.vector_store %arg8[%20, %c0_16, %c0_17], %23 {strides = array<i32>} : memref<2x128x256xf32, #tpu.memory_space<vmem>>, vector<1x128x256xf32>,
    } else {
    }
    %c0_i32_1 = arith.constant 0 : i32
    %3 = arith.cmpi eq, %arg2, %c0_i32_1 : i32
    %4 = arith.extui %3 : i1 to i32
    %c0_i32_2 = arith.constant 0 : i32
    %5 = arith.cmpi ne, %4, %c0_i32_2 : i32
    scf.if %5 {
      %cst_11 = arith.constant 0.000000e+00 : f32
      %17 = vector.broadcast %cst_11 : f32 to vector<128x256xf32>
      %c0_12 = arith.constant 0 : index
      %c0_13 = arith.constant 0 : index
      %18 = vector.load %arg7[%c0_12, %c0_13] : memref<128x256xf32, #tpu.memory_space<vmem>>, vector<128x256xf32>
      tpu.vector_store %arg7[%c0_12, %c0_13], %17 {strides = array<i32>} : memref<128x256xf32, #tpu.memory_space<vmem>>, vector<128x256xf32>,
    } else {
    }
    %c0 = arith.constant 0 : index
    %c0_3 = arith.constant 0 : index
    %6 = vector.load %arg7[%c0, %c0_3] : memref<128x256xf32, #tpu.memory_space<vmem>>, vector<128x256xf32>
    %7 = arith.index_cast %arg2 : i32 to index
    %c0_4 = arith.constant 0 : index
    %c0_5 = arith.constant 0 : index
    %8 = vector.load %arg8[%7, %c0_4, %c0_5] : memref<2x128x256xf32, #tpu.memory_space<vmem>>, vector<1x128x256xf32>
    %9 = vector.shape_cast %8 : vector<1x128x256xf32> to vector<128x256xf32>
    %c0_6 = arith.constant 0 : index
    %c0_7 = arith.constant 0 : index
    %10 = vector.load %arg5[%c0_6, %c0_7] : memref<256x256xf32, #tpu.memory_space<vmem>>, vector<256x256xf32>
    %cst = arith.constant dense<0.000000e+00> : vector<128x256xf32>
    %11 = tpu.matmul %9, %10, %cst {dimension_numbers = #tpu.dot_dimension_numbers<[1], [0], [0], [1], [0, 0, 1, 1], [], []>} : vector<128x256xf32>, vector<256x256xf32>, vector<128x256xf32> -> vector<128x256xf32>
    %12 = arith.addf %6, %11 : vector<128x256xf32>
    %c0_8 = arith.constant 0 : index
    %c0_9 = arith.constant 0 : index
    %13 = vector.load %arg7[%c0_8, %c0_9] : memref<128x256xf32, #tpu.memory_space<vmem>>, vector<128x256xf32>
    tpu.vector_store %arg7[%c0_8, %c0_9], %12 {strides = array<i32>} : memref<128x256xf32, #tpu.memory_space<vmem>>, vector<128x256xf32>,
    %c1_i32 = arith.constant 1 : i32
    %14 = arith.cmpi eq, %arg2, %c1_i32 : i32
    %15 = arith.extui %14 : i1 to i32
    %c0_i32_10 = arith.constant 0 : i32
    %16 = arith.cmpi ne, %15, %c0_i32_10 : i32
    scf.if %16 {
      %c0_11 = arith.constant 0 : index
      %c0_12 = arith.constant 0 : index
      %17 = vector.load %arg7[%c0_11, %c0_12] : memref<128x256xf32, #tpu.memory_space<vmem>>, vector<128x256xf32>
      %c0_13 = arith.constant 0 : index
      %c0_14 = arith.constant 0 : index
      %18 = vector.load %arg6[%c0_13, %c0_14] : memref<128x256xf32, #tpu.memory_space<vmem>>, vector<128x256xf32>
      tpu.vector_store %arg6[%c0_13, %c0_14], %17 {strides = array<i32>} : memref<128x256xf32, #tpu.memory_space<vmem>>, vector<128x256xf32>,
    } else {
    }
    return
  }
  func.func @transform_0(%arg0: i32, %arg1: i32, %arg2: i32) -> (i32, i32) {
    %c0_i32 = arith.constant 0 : i32
    %c0_i32_0 = arith.constant 0 : i32
    return %arg0, %c0_i32 : i32, i32
  }
  func.func @transform_1(%arg0: i32, %arg1: i32, %arg2: i32) -> (i32, i32) {
    %c0_i32 = arith.constant 0 : i32
    %0 = arith.cmpi eq, %arg1, %c0_i32 : i32
    %c1_i32 = arith.constant 1 : i32
    %1 = arith.select %0, %arg2, %c1_i32 : i32
    %c0_i32_0 = arith.constant 0 : i32
    %c0_i32_1 = arith.constant 0 : i32
    return %c0_i32_0, %1 : i32, i32
  }
  func.func @transform_2(%arg0: i32, %arg1: i32, %arg2: i32) -> (i32, i32) {
    %c0_i32 = arith.constant 0 : i32
    return %arg2, %arg1 : i32, i32
  }
  func.func @transform_3(%arg0: i32, %arg1: i32, %arg2: i32) -> (i32, i32) {
    %c0_i32 = arith.constant 0 : i32
    return %arg0, %arg1 : i32, i32
  }
}

</mosaic_0001>

<bundles_post_ra>
// kernel: bilinear_similarity.1
= control target key start
LH: loop header
LB: loop body
LE: loop exit
PB: predicated region body
PF: predicated region fallthrough
CT: control target
= control target key end

     0   :  { %8 = vsyncpa [#allocation5], 0  ;;  %s2922_s0 = inlined_call_operand.hbm [shape: f32[256,512], index: 0, kind: input, shape index: {}]   ;;  %s2923_s1 = inlined_call_operand.vmem [shape: f32[512,512], index: 1, kind: input, shape index: {}]   ;;  %s2924_s2 = inlined_call_operand.vmem [shape: f32[512,256], index: 2, kind: input, shape index: {}]   ;;  %s2925_s3 = inlined_call_operand.hbm [shape: f32[256,256], index: 3, kind: output, shape index: {}]  }
   0x1   :  { %10 = vsyncpa [#allocation5 + $0x1], 0 }
   0x2   :  { %11 = vsyncpa [#allocation6], 0 }
   0x3   :  { %13 = vsyncpa [#allocation6 + $0x1], 0  ;;  %s2081_s12 = smov 0   ;;  %s2083_s13 = smov 0  }
   0x4   :  { %s2085_s14 = smov 0   ;;  %s2087_s15 = smov 0  }
   0x5   :  { %s2089_s16 = smov 0   ;;  %s2091_s17 = smov 0  }
   0x6   :  { %s2093_s18 = smov 0   ;;  %s2095_s19 = smov 0  }
   0x7   :  { %s2097_s20 = smov 0   ;;  %s2099_s21 = smov 0  }
   0x8 LB: > { %s1718_s22 = sadd.s32 4294967295, %s2052_s21   ;;  %s1719_s23 = sadd.s32 4294967294, %s2052_s21   ;;  %s2052_s21 = sphi %s2099_s21, %s19_s21   ;;  %s2048_s20 = sphi %s2097_s20, %s2952_s20   ;;  %s2044_s19 = sphi %s2095_s19, %s2951_s19   ;;  %s2040_s18 = sphi %s2093_s18, %s2950_s18   ;;  %s2036_s17 = sphi %s2091_s17, %s2949_s17   ;;  %s2032_s16 = sphi %s2089_s16, %s2948_s16   ;;  %s2028_s15 = sphi %s2087_s15, %s2947_s15   ;;  %s2024_s14 = sphi %s2085_s14, %s2946_s14   ;;  %s2020_s13 = sphi %s2083_s13, %s2945_s13   ;;  %s2016_s12 = sphi %s2081_s12, %s2944_s12  }
   0x9   : > { %s31_s24 = sadd.s32 1, %s2044_s19  ;;  %s38_s25 = sadd.s32 1, %s2048_s20 }
   0xa   : > { %p32_p0 = scmp.ge.s32.totalorder %s31_s24, 2  ;;  %s45_s26 = sadd.s32 1, %s2032_s16 }
   0xb   : > { %p52_p1 = scmp.ne.s32.totalorder %s2032_s16, %s2028_s15  ;;  %p53_p2 = scmp.eq.s32.totalorder %s2052_s21, 0 }
   0xc   : > { %s2954_s24 = smov (%p32_p0, %s31_s24), 0  ;;  %s2956_s25 = smov (!%p32_p0, %s38_s25), %s2048_s20 }
   0xd   : > { %2929 = sst [smem:[#allocation11_spill]] %s2954_s24  ;;  %p2147_p3 = por %p53_p2, %p52_p1 }
   0xe   : > { %p58_p4 = scmp.ne.s32.totalorder %s2028_s15, %s2024_s14  ;;  %p40_p5 = scmp.ge.s32.totalorder %s2956_s25, 2 }
   0xf   : > { %p59_p6 = scmp.eq.s32.totalorder %s1718_s22, 0  ;;  %s72_s28 = ssub.s32 %s2044_s19, %s2954_s24 }
  0x10   : > { %s75_s29 = sadd.s32 1, %s2020_s13  ;;  %s2958_s25 = smov (%p40_p5, %s2956_s25), 0 }
  0x11   : > { %2931 = sst [smem:[#allocation12_spill]] %s2958_s25  ;;  %p2161_p7 = por %p59_p6, %p58_p4 }
  0x12   : > { %p73_p8 = scmp.eq.s32.totalorder %s72_s28, 0  ;;  %s42_s4 = ssub.s32 %s2048_s20, %s2958_s25 }
  0x13   : > { %p82_p9 = scmp.ne.s32.totalorder %s2020_s13, %s2016_s12  ;;  %p43_p10 = scmp.eq.s32.totalorder %s42_s4, 0 }
  0x14   : > { %p142_p11 = scmp.eq.s32.totalorder %s1718_s22, 3  ;;  %p148_p0 = scmp.eq.s32.totalorder %s1719_s23, 3 }
  0x15   : > { %s2170_s5 = scalar_select %p73_p8, %s2020_s13, %s75_s29  }
  0x16   : > { %s2173_s6 = scalar_select %p43_p10, %s2032_s16, %s45_s26  }
  0x17   : > { %2933 = sst [smem:[#allocation13_spill]] %s2170_s5  ;;  %p2177_p12 = por %p82_p9, %p53_p2 }
  0x18   : > { %2934 = sst [smem:[#allocation14_spill]] %s2173_s6  ;;  %p2184_p13 = por %p142_p11, %p52_p1 }
  0x19   : > { %p2191_p5 = por %p148_p0, %p58_p4  ;;  %p1721_p6 = scmp.ge.s32.totalorder %s2052_s21, 4 }
  0x1a   : > { %s168_s10 = sand.u32 (!%p1721_p6), 1, %s2032_s16   ;;  %s1749_s11 = sshll.u32 (!%p1721_p6), %s2048_s20, 13 }
  0x1b   : > { %s2937_s9 = scalar_select %p2191_p5, 1, 0 }
  0x1c   : > { %164 = sbr.rel (%p1721_p6) target bundleno = 112 (0x70), region = 16  ;;  %s1722_s22 = sshll.u32 (!%p1721_p6), %s168_s10, 9 }
  0x1d   : > { %2938 = sst [smem:[#allocation15_spill]] %s2937_s9  ;;  %s179_s29 = scalar_lea.hbm (!%p1721_p6), %s2922_s0, %s1749_s11 }
  0x1e   : > { %s172_s4 = scalar_lea.vmem (!%p1721_p6), [#allocation4], %s1722_s22  ;;  %s169_s25 = scalar_lea.sflag (!%p1721_p6), [#allocation5], %s168_s10 }
  0x1f   : > { %s180_s23 = sshll.u32 (!%p1721_p6), %s172_s4, 4  ;;  %s2054_s6 = smov (!%p1721_p6), [#allocation4]   ;;  %s181_s23 = int_to_ptr.vmem [resolvable:$true] %s180_s23 }
  0x20   : > { %s1926_s24 = scalar_lea.vmem (!%p1721_p6), %s181_s23, 8192  ;;  %s1930_s5 = sshll.u32 (!%p1721_p6), %s2054_s6, 4  ;;  %s1931_s5 = int_to_ptr.vmem [resolvable:$false] %s1930_s5 }
  0x21   : > { %p1927_p1 = scmp.ne.s32.totalorder %s181_s23, %s1926_s24  ;;  %s1932_s9 = scalar_lea.vmem %s1931_s5, 16384 }
  0x22   : > { %p1933_p8 = scmp.lt.s32.totalorder %s181_s23, %s1931_s5  ;;  %p1934_p9 = scmp.lt.s32.totalorder %s1932_s9, %s1926_s24 }
  0x23   : > { %p1928_p2 = pnand %p1927_p1, %p2147_p3 }
  0x24   : > { %p1935_p10 = por %p1934_p9, %p1933_p8 }
  0x25   : > { %p1929_p4 = pneg %p1928_p2 }
  0x27   : > { %p1936_p11 = pnand %p1935_p10, %p1929_p4 }
  0x29   : > { %1939 = shalt.err (!%p1936_p11)
}
  0x2a   : > { %s2055_s26 = smov 512   ;;  %s2056_s11 = smov 32  }
  0x2b   : > { %1820 = dma.hbm_to_vmem [thread:$0]  (%p2147_p3), %s179_s29, 8192, %s181_s23, %s169_s25, %s2055_s26, %s2055_s26, %s2056_s11  }
  0x2c   : > { %189 = sbr.rel (!%p2177_p12) target bundleno = 112 (0x70), region = 24  ;;  %s191_s10 = sand.u32 (%p2177_p12), 1, %s2020_s13  }
  0x2d   : > { %s1750_s22 = sshll.u32 (%p2177_p12), %s2044_s19, 4  ;;  %s1726_s6 = sshll.u32 (%p2177_p12), %s191_s10, 10 }
  0x2e   : > { %s2212_s24 = scalar_lea.vmem (%p2177_p12), %s2923_s1, %s1750_s22  ;;  %s2217_s25 = scalar_lea.vmem (%p2177_p12), [#allocation7], %s1726_s6 }
  0x2f   : > { %v211_v0 = vld [vmem:[%s2212_s24] sm:$0xff] (%p2177_p12)  ;;  %v213_v1 = vld [vmem:[%s2212_s24 + $0x8] sm:$0xff] (%p2177_p12) }
  0x30   : > { %v215_v2 = vld [vmem:[%s2212_s24 + $0x20] sm:$0xff] (%p2177_p12)  ;;  %212 = vst [vmem:[%s2217_s25] sm:$0xff] (%p2177_p12), %v211_v0  ;;  %214 = vst [vmem:[%s2217_s25 + $0x8] sm:$0xff] (%p2177_p12), %v213_v1  ;;  %v217_v3 = vld [vmem:[%s2212_s24 + $0x28] sm:$0xff] (%p2177_p12) }
  0x31   : > { %216 = vst [vmem:[%s2217_s25 + $0x10] sm:$0xff] %v215_v2  ;;  %v219_v4 = vld [vmem:[%s2212_s24 + $0x40] sm:$0xff]  ;;  %v221_v5 = vld [vmem:[%s2212_s24 + $0x48] sm:$0xff]  ;;  %218 = vst [vmem:[%s2217_s25 + $0x18] sm:$0xff] %v217_v3 }
  0x32   : > { %220 = vst [vmem:[%s2217_s25 + $0x20] sm:$0xff] %v219_v4  ;;  %222 = vst [vmem:[%s2217_s25 + $0x28] sm:$0xff] %v221_v5  ;;  %v223_v6 = vld [vmem:[%s2212_s24 + $0x60] sm:$0xff]  ;;  %v225_v7 = vld [vmem:[%s2212_s24 + $0x68] sm:$0xff] }
  0x33   : > { %v227_v8 = vld [vmem:[%s2212_s24 + $0x80] sm:$0xff]  ;;  %224 = vst [vmem:[%s2217_s25 + $0x30] sm:$0xff] %v223_v6  ;;  %226 = vst [vmem:[%s2217_s25 + $0x38] sm:$0xff] %v225_v7  ;;  %v229_v9 = vld [vmem:[%s2212_s24 + $0x88] sm:$0xff] }
  0x34   : > { %228 = vst [vmem:[%s2217_s25 + $0x40] sm:$0xff] %v227_v8  ;;  %v231_v10 = vld [vmem:[%s2212_s24 + $0xa0] sm:$0xff]  ;;  %v233_v11 = vld [vmem:[%s2212_s24 + $0xa8] sm:$0xff]  ;;  %230 = vst [vmem:[%s2217_s25 + $0x48] sm:$0xff] %v229_v9 }
  0x35   : > { %232 = vst [vmem:[%s2217_s25 + $0x50] sm:$0xff] %v231_v10  ;;  %234 = vst [vmem:[%s2217_s25 + $0x58] sm:$0xff] %v233_v11  ;;  %v235_v12 = vld [vmem:[%s2212_s24 + $0xc0] sm:$0xff]  ;;  %v237_v13 = vld [vmem:[%s2212_s24 + $0xc8] sm:$0xff] }
  0x36   : > { %v239_v14 = vld [vmem:[%s2212_s24 + $0xe0] sm:$0xff]  ;;  %236 = vst [vmem:[%s2217_s25 + $0x60] sm:$0xff] %v235_v12  ;;  %238 = vst [vmem:[%s2217_s25 + $0x68] sm:$0xff] %v237_v13  ;;  %v241_v15 = vld [vmem:[%s2212_s24 + $0xe8] sm:$0xff] }
  0x37   : > { %240 = vst [vmem:[%s2217_s25 + $0x70] sm:$0xff] %v239_v14  ;;  %v243_v16 = vld [vmem:[%s2212_s24 + $0x100] sm:$0xff]  ;;  %v245_v17 = vld [vmem:[%s2212_s24 + $0x108] sm:$0xff]  ;;  %242 = vst [vmem:[%s2217_s25 + $0x78] sm:$0xff] %v241_v15 }
  0x38   : > { %244 = vst [vmem:[%s2217_s25 + $0x80] sm:$0xff] %v243_v16  ;;  %246 = vst [vmem:[%s2217_s25 + $0x88] sm:$0xff] %v245_v17  ;;  %v247_v18 = vld [vmem:[%s2212_s24 + $0x120] sm:$0xff]  ;;  %v249_v19 = vld [vmem:[%s2212_s24 + $0x128] sm:$0xff] }
  0x39   : > { %v251_v20 = vld [vmem:[%s2212_s24 + $0x140] sm:$0xff]  ;;  %248 = vst [vmem:[%s2217_s25 + $0x90] sm:$0xff] %v247_v18  ;;  %250 = vst [vmem:[%s2217_s25 + $0x98] sm:$0xff] %v249_v19  ;;  %v253_v21 = vld [vmem:[%s2212_s24 + $0x148] sm:$0xff] }
  0x3a   : > { %252 = vst [vmem:[%s2217_s25 + $0xa0] sm:$0xff] %v251_v20  ;;  %v255_v22 = vld [vmem:[%s2212_s24 + $0x160] sm:$0xff]  ;;  %v257_v23 = vld [vmem:[%s2212_s24 + $0x168] sm:$0xff]  ;;  %254 = vst [vmem:[%s2217_s25 + $0xa8] sm:$0xff] %v253_v21 }
  0x3b   : > { %256 = vst [vmem:[%s2217_s25 + $0xb0] sm:$0xff] %v255_v22  ;;  %258 = vst [vmem:[%s2217_s25 + $0xb8] sm:$0xff] %v257_v23  ;;  %v259_v24 = vld [vmem:[%s2212_s24 + $0x180] sm:$0xff]  ;;  %v261_v25 = vld [vmem:[%s2212_s24 + $0x188] sm:$0xff] }
  0x3c   : > { %v263_v26 = vld [vmem:[%s2212_s24 + $0x1a0] sm:$0xff]  ;;  %260 = vst [vmem:[%s2217_s25 + $0xc0] sm:$0xff] %v259_v24  ;;  %262 = vst [vmem:[%s2217_s25 + $0xc8] sm:$0xff] %v261_v25  ;;  %v265_v27 = vld [vmem:[%s2212_s24 + $0x1a8] sm:$0xff] }
  0x3d   : > { %264 = vst [vmem:[%s2217_s25 + $0xd0] sm:$0xff] %v263_v26  ;;  %v267_v28 = vld [vmem:[%s2212_s24 + $0x1c0] sm:$0xff]  ;;  %v269_v29 = vld [vmem:[%s2212_s24 + $0x1c8] sm:$0xff]  ;;  %266 = vst [vmem:[%s2217_s25 + $0xd8] sm:$0xff] %v265_v27 }
  0x3e   : > { %268 = vst [vmem:[%s2217_s25 + $0xe0] sm:$0xff] %v267_v28  ;;  %270 = vst [vmem:[%s2217_s25 + $0xe8] sm:$0xff] %v269_v29  ;;  %v271_v30 = vld [vmem:[%s2212_s24 + $0x1e0] sm:$0xff]  ;;  %v273_v31 = vld [vmem:[%s2212_s24 + $0x1e8] sm:$0xff] }
  0x3f   : > { %v275_v32 = vld [vmem:[%s2212_s24 + $0x200] sm:$0xff]  ;;  %272 = vst [vmem:[%s2217_s25 + $0xf0] sm:$0xff] %v271_v30  ;;  %274 = vst [vmem:[%s2217_s25 + $0xf8] sm:$0xff] %v273_v31  ;;  %v277_v33 = vld [vmem:[%s2212_s24 + $0x208] sm:$0xff] }
  0x40   : > { %276 = vst [vmem:[%s2217_s25 + $0x100] sm:$0xff] %v275_v32  ;;  %v279_v34 = vld [vmem:[%s2212_s24 + $0x220] sm:$0xff]  ;;  %v281_v35 = vld [vmem:[%s2212_s24 + $0x228] sm:$0xff]  ;;  %278 = vst [vmem:[%s2217_s25 + $0x108] sm:$0xff] %v277_v33 }
  0x41   : > { %280 = vst [vmem:[%s2217_s25 + $0x110] sm:$0xff] %v279_v34  ;;  %282 = vst [vmem:[%s2217_s25 + $0x118] sm:$0xff] %v281_v35  ;;  %v283_v36 = vld [vmem:[%s2212_s24 + $0x240] sm:$0xff]  ;;  %v285_v37 = vld [vmem:[%s2212_s24 + $0x248] sm:$0xff] }
  0x42   : > { %v287_v38 = vld [vmem:[%s2212_s24 + $0x260] sm:$0xff]  ;;  %284 = vst [vmem:[%s2217_s25 + $0x120] sm:$0xff] %v283_v36  ;;  %286 = vst [vmem:[%s2217_s25 + $0x128] sm:$0xff] %v285_v37  ;;  %v289_v39 = vld [vmem:[%s2212_s24 + $0x268] sm:$0xff] }
  0x43   : > { %288 = vst [vmem:[%s2217_s25 + $0x130] sm:$0xff] %v287_v38  ;;  %v291_v40 = vld [vmem:[%s2212_s24 + $0x280] sm:$0xff]  ;;  %v293_v41 = vld [vmem:[%s2212_s24 + $0x288] sm:$0xff]  ;;  %290 = vst [vmem:[%s2217_s25 + $0x138] sm:$0xff] %v289_v39 }
  0x44   : > { %292 = vst [vmem:[%s2217_s25 + $0x140] sm:$0xff] %v291_v40  ;;  %294 = vst [vmem:[%s2217_s25 + $0x148] sm:$0xff] %v293_v41  ;;  %v295_v42 = vld [vmem:[%s2212_s24 + $0x2a0] sm:$0xff]  ;;  %v297_v43 = vld [vmem:[%s2212_s24 + $0x2a8] sm:$0xff] }
  0x45   : > { %v299_v44 = vld [vmem:[%s2212_s24 + $0x2c0] sm:$0xff]  ;;  %296 = vst [vmem:[%s2217_s25 + $0x150] sm:$0xff] %v295_v42  ;;  %298 = vst [vmem:[%s2217_s25 + $0x158] sm:$0xff] %v297_v43  ;;  %v301_v45 = vld [vmem:[%s2212_s24 + $0x2c8] sm:$0xff] }
  0x46   : > { %300 = vst [vmem:[%s2217_s25 + $0x160] sm:$0xff] %v299_v44  ;;  %v303_v46 = vld [vmem:[%s2212_s24 + $0x2e0] sm:$0xff]  ;;  %v305_v47 = vld [vmem:[%s2212_s24 + $0x2e8] sm:$0xff]  ;;  %302 = vst [vmem:[%s2217_s25 + $0x168] sm:$0xff] %v301_v45 }
  0x47   : > { %304 = vst [vmem:[%s2217_s25 + $0x170] sm:$0xff] %v303_v46  ;;  %306 = vst [vmem:[%s2217_s25 + $0x178] sm:$0xff] %v305_v47  ;;  %v307_v48 = vld [vmem:[%s2212_s24 + $0x300] sm:$0xff]  ;;  %v309_v49 = vld [vmem:[%s2212_s24 + $0x308] sm:$0xff] }
  0x48   : > { %v311_v50 = vld [vmem:[%s2212_s24 + $0x320] sm:$0xff]  ;;  %308 = vst [vmem:[%s2217_s25 + $0x180] sm:$0xff] %v307_v48  ;;  %310 = vst [vmem:[%s2217_s25 + $0x188] sm:$0xff] %v309_v49  ;;  %v313_v51 = vld [vmem:[%s2212_s24 + $0x328] sm:$0xff] }
  0x49   : > { %312 = vst [vmem:[%s2217_s25 + $0x190] sm:$0xff] %v311_v50  ;;  %v315_v52 = vld [vmem:[%s2212_s24 + $0x340] sm:$0xff]  ;;  %v317_v53 = vld [vmem:[%s2212_s24 + $0x348] sm:$0xff]  ;;  %314 = vst [vmem:[%s2217_s25 + $0x198] sm:$0xff] %v313_v51 }
  0x4a   : > { %316 = vst [vmem:[%s2217_s25 + $0x1a0] sm:$0xff] %v315_v52  ;;  %318 = vst [vmem:[%s2217_s25 + $0x1a8] sm:$0xff] %v317_v53  ;;  %v319_v54 = vld [vmem:[%s2212_s24 + $0x360] sm:$0xff]  ;;  %v321_v55 = vld [vmem:[%s2212_s24 + $0x368] sm:$0xff] }
  0x4b   : > { %v323_v56 = vld [vmem:[%s2212_s24 + $0x380] sm:$0xff]  ;;  %320 = vst [vmem:[%s2217_s25 + $0x1b0] sm:$0xff] %v319_v54  ;;  %322 = vst [vmem:[%s2217_s25 + $0x1b8] sm:$0xff] %v321_v55  ;;  %v325_v57 = vld [vmem:[%s2212_s24 + $0x388] sm:$0xff] }
  0x4c   : > { %324 = vst [vmem:[%s2217_s25 + $0x1c0] sm:$0xff] %v323_v56  ;;  %v327_v58 = vld [vmem:[%s2212_s24 + $0x3a0] sm:$0xff]  ;;  %v329_v59 = vld [vmem:[%s2212_s24 + $0x3a8] sm:$0xff]  ;;  %326 = vst [vmem:[%s2217_s25 + $0x1c8] sm:$0xff] %v325_v57 }
  0x4d   : > { %328 = vst [vmem:[%s2217_s25 + $0x1d0] sm:$0xff] %v327_v58  ;;  %330 = vst [vmem:[%s2217_s25 + $0x1d8] sm:$0xff] %v329_v59  ;;  %v331_v60 = vld [vmem:[%s2212_s24 + $0x3c0] sm:$0xff]  ;;  %v333_v61 = vld [vmem:[%s2212_s24 + $0x3c8] sm:$0xff] }
  0x4e   : > { %v335_v62 = vld [vmem:[%s2212_s24 + $0x3e0] sm:$0xff]  ;;  %332 = vst [vmem:[%s2217_s25 + $0x1e0] sm:$0xff] %v331_v60  ;;  %334 = vst [vmem:[%s2217_s25 + $0x1e8] sm:$0xff] %v333_v61  ;;  %v337_v63 = vld [vmem:[%s2212_s24 + $0x3e8] sm:$0xff] }
  0x4f   : > { %336 = vst [vmem:[%s2217_s25 + $0x1f0] sm:$0xff] %v335_v62  ;;  %v339_v0 = vld [vmem:[%s2212_s24 + $0x400] sm:$0xff]  ;;  %v341_v1 = vld [vmem:[%s2212_s24 + $0x408] sm:$0xff]  ;;  %338 = vst [vmem:[%s2217_s25 + $0x1f8] sm:$0xff] %v337_v63 }
  0x50   : > { %340 = vst [vmem:[%s2217_s25 + $0x200] sm:$0xff] %v339_v0  ;;  %342 = vst [vmem:[%s2217_s25 + $0x208] sm:$0xff] %v341_v1  ;;  %v343_v2 = vld [vmem:[%s2212_s24 + $0x420] sm:$0xff]  ;;  %v345_v3 = vld [vmem:[%s2212_s24 + $0x428] sm:$0xff] }
  0x51   : > { %v347_v4 = vld [vmem:[%s2212_s24 + $0x440] sm:$0xff]  ;;  %344 = vst [vmem:[%s2217_s25 + $0x210] sm:$0xff] %v343_v2  ;;  %346 = vst [vmem:[%s2217_s25 + $0x218] sm:$0xff] %v345_v3  ;;  %v349_v5 = vld [vmem:[%s2212_s24 + $0x448] sm:$0xff] }
  0x52   : > { %348 = vst [vmem:[%s2217_s25 + $0x220] sm:$0xff] %v347_v4  ;;  %v351_v6 = vld [vmem:[%s2212_s24 + $0x460] sm:$0xff]  ;;  %v353_v7 = vld [vmem:[%s2212_s24 + $0x468] sm:$0xff]  ;;  %350 = vst [vmem:[%s2217_s25 + $0x228] sm:$0xff] %v349_v5 }
  0x53   : > { %352 = vst [vmem:[%s2217_s25 + $0x230] sm:$0xff] %v351_v6  ;;  %354 = vst [vmem:[%s2217_s25 + $0x238] sm:$0xff] %v353_v7  ;;  %v355_v8 = vld [vmem:[%s2212_s24 + $0x480] sm:$0xff]  ;;  %v357_v9 = vld [vmem:[%s2212_s24 + $0x488] sm:$0xff] }
  0x54   : > { %v359_v10 = vld [vmem:[%s2212_s24 + $0x4a0] sm:$0xff]  ;;  %356 = vst [vmem:[%s2217_s25 + $0x240] sm:$0xff] %v355_v8  ;;  %358 = vst [vmem:[%s2217_s25 + $0x248] sm:$0xff] %v357_v9  ;;  %v361_v11 = vld [vmem:[%s2212_s24 + $0x4a8] sm:$0xff] }
  0x55   : > { %360 = vst [vmem:[%s2217_s25 + $0x250] sm:$0xff] %v359_v10  ;;  %v363_v12 = vld [vmem:[%s2212_s24 + $0x4c0] sm:$0xff]  ;;  %v365_v13 = vld [vmem:[%s2212_s24 + $0x4c8] sm:$0xff]  ;;  %362 = vst [vmem:[%s2217_s25 + $0x258] sm:$0xff] %v361_v11 }
  0x56   : > { %364 = vst [vmem:[%s2217_s25 + $0x260] sm:$0xff] %v363_v12  ;;  %366 = vst [vmem:[%s2217_s25 + $0x268] sm:$0xff] %v365_v13  ;;  %v367_v14 = vld [vmem:[%s2212_s24 + $0x4e0] sm:$0xff]  ;;  %v369_v15 = vld [vmem:[%s2212_s24 + $0x4e8] sm:$0xff] }
  0x57   : > { %v371_v16 = vld [vmem:[%s2212_s24 + $0x500] sm:$0xff]  ;;  %368 = vst [vmem:[%s2217_s25 + $0x270] sm:$0xff] %v367_v14  ;;  %370 = vst [vmem:[%s2217_s25 + $0x278] sm:$0xff] %v369_v15  ;;  %v373_v17 = vld [vmem:[%s2212_s24 + $0x508] sm:$0xff] }
  0x58   : > { %372 = vst [vmem:[%s2217_s25 + $0x280] sm:$0xff] %v371_v16  ;;  %v375_v18 = vld [vmem:[%s2212_s24 + $0x520] sm:$0xff]  ;;  %v377_v19 = vld [vmem:[%s2212_s24 + $0x528] sm:$0xff]  ;;  %374 = vst [vmem:[%s2217_s25 + $0x288] sm:$0xff] %v373_v17 }
  0x59   : > { %376 = vst [vmem:[%s2217_s25 + $0x290] sm:$0xff] %v375_v18  ;;  %378 = vst [vmem:[%s2217_s25 + $0x298] sm:$0xff] %v377_v19  ;;  %v379_v20 = vld [vmem:[%s2212_s24 + $0x540] sm:$0xff]  ;;  %v381_v21 = vld [vmem:[%s2212_s24 + $0x548] sm:$0xff] }
  0x5a   : > { %v383_v22 = vld [vmem:[%s2212_s24 + $0x560] sm:$0xff]  ;;  %380 = vst [vmem:[%s2217_s25 + $0x2a0] sm:$0xff] %v379_v20  ;;  %382 = vst [vmem:[%s2217_s25 + $0x2a8] sm:$0xff] %v381_v21  ;;  %v385_v23 = vld [vmem:[%s2212_s24 + $0x568] sm:$0xff] }
  0x5b   : > { %384 = vst [vmem:[%s2217_s25 + $0x2b0] sm:$0xff] %v383_v22  ;;  %v387_v24 = vld [vmem:[%s2212_s24 + $0x580] sm:$0xff]  ;;  %v389_v25 = vld [vmem:[%s2212_s24 + $0x588] sm:$0xff]  ;;  %386 = vst [vmem:[%s2217_s25 + $0x2b8] sm:$0xff] %v385_v23 }
  0x5c   : > { %388 = vst [vmem:[%s2217_s25 + $0x2c0] sm:$0xff] %v387_v24  ;;  %390 = vst [vmem:[%s2217_s25 + $0x2c8] sm:$0xff] %v389_v25  ;;  %v391_v26 = vld [vmem:[%s2212_s24 + $0x5a0] sm:$0xff]  ;;  %v393_v27 = vld [vmem:[%s2212_s24 + $0x5a8] sm:$0xff] }
  0x5d   : > { %v395_v28 = vld [vmem:[%s2212_s24 + $0x5c0] sm:$0xff]  ;;  %392 = vst [vmem:[%s2217_s25 + $0x2d0] sm:$0xff] %v391_v26  ;;  %394 = vst [vmem:[%s2217_s25 + $0x2d8] sm:$0xff] %v393_v27  ;;  %v397_v29 = vld [vmem:[%s2212_s24 + $0x5c8] sm:$0xff] }
  0x5e   : > { %396 = vst [vmem:[%s2217_s25 + $0x2e0] sm:$0xff] %v395_v28  ;;  %v399_v30 = vld [vmem:[%s2212_s24 + $0x5e0] sm:$0xff]  ;;  %v401_v31 = vld [vmem:[%s2212_s24 + $0x5e8] sm:$0xff]  ;;  %398 = vst [vmem:[%s2217_s25 + $0x2e8] sm:$0xff] %v397_v29 }
  0x5f   : > { %400 = vst [vmem:[%s2217_s25 + $0x2f0] sm:$0xff] %v399_v30  ;;  %402 = vst [vmem:[%s2217_s25 + $0x2f8] sm:$0xff] %v401_v31  ;;  %v403_v32 = vld [vmem:[%s2212_s24 + $0x600] sm:$0xff]  ;;  %v405_v33 = vld [vmem:[%s2212_s24 + $0x608] sm:$0xff] }
  0x60   : > { %v407_v34 = vld [vmem:[%s2212_s24 + $0x620] sm:$0xff]  ;;  %404 = vst [vmem:[%s2217_s25 + $0x300] sm:$0xff] %v403_v32  ;;  %406 = vst [vmem:[%s2217_s25 + $0x308] sm:$0xff] %v405_v33  ;;  %v409_v35 = vld [vmem:[%s2212_s24 + $0x628] sm:$0xff] }
  0x61   : > { %408 = vst [vmem:[%s2217_s25 + $0x310] sm:$0xff] %v407_v34  ;;  %v411_v36 = vld [vmem:[%s2212_s24 + $0x640] sm:$0xff]  ;;  %v413_v37 = vld [vmem:[%s2212_s24 + $0x648] sm:$0xff]  ;;  %410 = vst [vmem:[%s2217_s25 + $0x318] sm:$0xff] %v409_v35 }
  0x62   : > { %412 = vst [vmem:[%s2217_s25 + $0x320] sm:$0xff] %v411_v36  ;;  %414 = vst [vmem:[%s2217_s25 + $0x328] sm:$0xff] %v413_v37  ;;  %v415_v38 = vld [vmem:[%s2212_s24 + $0x660] sm:$0xff]  ;;  %v417_v39 = vld [vmem:[%s2212_s24 + $0x668] sm:$0xff] }
  0x63   : > { %v419_v40 = vld [vmem:[%s2212_s24 + $0x680] sm:$0xff]  ;;  %416 = vst [vmem:[%s2217_s25 + $0x330] sm:$0xff] %v415_v38  ;;  %418 = vst [vmem:[%s2217_s25 + $0x338] sm:$0xff] %v417_v39  ;;  %v421_v41 = vld [vmem:[%s2212_s24 + $0x688] sm:$0xff] }
  0x64   : > { %420 = vst [vmem:[%s2217_s25 + $0x340] sm:$0xff] %v419_v40  ;;  %v423_v42 = vld [vmem:[%s2212_s24 + $0x6a0] sm:$0xff]  ;;  %v425_v43 = vld [vmem:[%s2212_s24 + $0x6a8] sm:$0xff]  ;;  %422 = vst [vmem:[%s2217_s25 + $0x348] sm:$0xff] %v421_v41 }
  0x65   : > { %424 = vst [vmem:[%s2217_s25 + $0x350] sm:$0xff] %v423_v42  ;;  %426 = vst [vmem:[%s2217_s25 + $0x358] sm:$0xff] %v425_v43  ;;  %v427_v44 = vld [vmem:[%s2212_s24 + $0x6c0] sm:$0xff]  ;;  %v429_v45 = vld [vmem:[%s2212_s24 + $0x6c8] sm:$0xff] }
  0x66   : > { %v431_v46 = vld [vmem:[%s2212_s24 + $0x6e0] sm:$0xff]  ;;  %428 = vst [vmem:[%s2217_s25 + $0x360] sm:$0xff] %v427_v44  ;;  %430 = vst [vmem:[%s2217_s25 + $0x368] sm:$0xff] %v429_v45  ;;  %v433_v47 = vld [vmem:[%s2212_s24 + $0x6e8] sm:$0xff] }
  0x67   : > { %432 = vst [vmem:[%s2217_s25 + $0x370] sm:$0xff] %v431_v46  ;;  %v435_v48 = vld [vmem:[%s2212_s24 + $0x700] sm:$0xff]  ;;  %v437_v49 = vld [vmem:[%s2212_s24 + $0x708] sm:$0xff]  ;;  %434 = vst [vmem:[%s2217_s25 + $0x378] sm:$0xff] %v433_v47 }
  0x68   : > { %436 = vst [vmem:[%s2217_s25 + $0x380] sm:$0xff] %v435_v48  ;;  %438 = vst [vmem:[%s2217_s25 + $0x388] sm:$0xff] %v437_v49  ;;  %v439_v50 = vld [vmem:[%s2212_s24 + $0x720] sm:$0xff]  ;;  %v441_v51 = vld [vmem:[%s2212_s24 + $0x728] sm:$0xff] }
  0x69   : > { %v443_v52 = vld [vmem:[%s2212_s24 + $0x740] sm:$0xff]  ;;  %440 = vst [vmem:[%s2217_s25 + $0x390] sm:$0xff] %v439_v50  ;;  %442 = vst [vmem:[%s2217_s25 + $0x398] sm:$0xff] %v441_v51  ;;  %v445_v53 = vld [vmem:[%s2212_s24 + $0x748] sm:$0xff] }
  0x6a   : > { %444 = vst [vmem:[%s2217_s25 + $0x3a0] sm:$0xff] %v443_v52  ;;  %v447_v54 = vld [vmem:[%s2212_s24 + $0x760] sm:$0xff]  ;;  %v449_v55 = vld [vmem:[%s2212_s24 + $0x768] sm:$0xff]  ;;  %446 = vst [vmem:[%s2217_s25 + $0x3a8] sm:$0xff] %v445_v53 }
  0x6b   : > { %448 = vst [vmem:[%s2217_s25 + $0x3b0] sm:$0xff] %v447_v54  ;;  %450 = vst [vmem:[%s2217_s25 + $0x3b8] sm:$0xff] %v449_v55  ;;  %v451_v56 = vld [vmem:[%s2212_s24 + $0x780] sm:$0xff]  ;;  %v453_v57 = vld [vmem:[%s2212_s24 + $0x788] sm:$0xff] }
  0x6c   : > { %v455_v58 = vld [vmem:[%s2212_s24 + $0x7a0] sm:$0xff]  ;;  %452 = vst [vmem:[%s2217_s25 + $0x3c0] sm:$0xff] %v451_v56  ;;  %454 = vst [vmem:[%s2217_s25 + $0x3c8] sm:$0xff] %v453_v57  ;;  %v457_v59 = vld [vmem:[%s2212_s24 + $0x7a8] sm:$0xff] }
  0x6d   : > { %456 = vst [vmem:[%s2217_s25 + $0x3d0] sm:$0xff] %v455_v58  ;;  %v459_v60 = vld [vmem:[%s2212_s24 + $0x7c0] sm:$0xff]  ;;  %v461_v61 = vld [vmem:[%s2212_s24 + $0x7c8] sm:$0xff]  ;;  %458 = vst [vmem:[%s2217_s25 + $0x3d8] sm:$0xff] %v457_v59 }
  0x6e   : > { %460 = vst [vmem:[%s2217_s25 + $0x3e0] sm:$0xff] %v459_v60  ;;  %462 = vst [vmem:[%s2217_s25 + $0x3e8] sm:$0xff] %v461_v61  ;;  %v463_v62 = vld [vmem:[%s2212_s24 + $0x7e0] sm:$0xff]  ;;  %v465_v63 = vld [vmem:[%s2212_s24 + $0x7e8] sm:$0xff] }
  0x6f   : > { %464 = vst [vmem:[%s2217_s25 + $0x3f0] sm:$0xff] %v463_v62  ;;  %466 = vst [vmem:[%s2217_s25 + $0x3f8] sm:$0xff] %v465_v63 }
  0x70 PF: > { %p1729_p3 = scmp.ge.s32.totalorder %s2052_s21, 1  ;;  %p486_p12 = scmp.lt.s32.totalorder %s2052_s21, 5 }
  0x72   : > { %p487_p0 = pnand %p1729_p3, %p486_p12 }
  0x73   : > { %s2475_s27 = sand.u32 (!%p487_p0), 1, %s2028_s15  }
  0x74   : > { %490 = sbr.rel (%p487_p0) target bundleno = 800 (0x320), region = 51  ;;  %s1730_s5 = sshll.u32 (!%p487_p0), %s2475_s27, 9 }
  0x75   : > { %s493_s7 = scalar_lea.sflag (!%p487_p0), [#allocation5], %s2475_s27  ;;  %s2479_s9 = scalar_lea.vmem (!%p487_p0), [#allocation4], %s1730_s5 }
  0x79   : > { %2007 = dma.done.wait (%p2161_p7), %s493_s7, 8192  }
  0x7a   : > { %2009 = vsyncadd (%p2161_p7), %s493_s7, 4294959104  ;;  %s502_s29 = sand.u32 1, %s2016_s12   ;;  %s1732_s23 = sshll.u32 %s2475_s27, 8 }
  0x7b   : > { %s1731_s26 = sshll.u32 %s502_s29, 10  ;;  %s1733_s11 = sshll.u32 %s2036_s17, 5 }
  0x7c   : > { %p546_p6 = scmp.lt.s32.totalorder %s1733_s11, 63  ;;  %s2488_s22 = scalar_lea.vmem [#allocation7], %s1731_s26 }
  0x7d   : > { %v657_v0 = vld [vmem:[%s2488_s22 + $0xf8] sm:$0xff]  ;;  %v656_v2 = vld [vmem:[%s2488_s22 + $0xf0] sm:$0xff]  ;;  %v655_v4 = vld [vmem:[%s2488_s22 + $0xe8] sm:$0xff]  ;;  %s1752_s28 = sshll.u32 %s2036_s17, 8  ;;  %s2724_s24 = scalar_lea.vmem [#allocation8], %s1732_s23 }
  0x7e   : > { %s2960_s11 = smov (!%p546_p6, %s1733_s11), 63  ;;  %v721_v1 = vld [vmem:[%s2488_s22 + $0x2f8] sm:$0xff]  ;;  %754 = vmatprep.subr.mxu0 %v657_v0  ;;  %v720_v3 = vld [vmem:[%s2488_s22 + $0x2f0] sm:$0xff]  ;;  %v719_v5 = vld [vmem:[%s2488_s22 + $0x2e8] sm:$0xff]  ;;  %s2688_s4 = scalar_lea.vmem [#allocation3], %s1752_s28 }
  0x7f   : > { %s1751_s10 = sshll.u32 %s2960_s11, 4  ;;  %915 = vmatprep.subr.mxu1 %v721_v1  ;;  %755 = vmatpush1.msra.mxu0 %v656_v2  ;;  %v654_v6 = vld [vmem:[%s2488_s22 + $0xe0] sm:$0xff]  ;;  %v653_v8 = vld [vmem:[%s2488_s22 + $0xd8] sm:$0xff]  ;;  %v652_v10 = vld [vmem:[%s2488_s22 + $0xd0] sm:$0xff]  ;;  %p1738_p7 = scmp.ne.s32.totalorder %s2036_s17, 0 }
  0x80   : > { %s2496_s6 = scalar_lea.vmem %s2924_s2, %s1751_s10  ;;  %916 = vmatpush1.msra.mxu1 %v720_v3  ;;  %v718_v7 = vld [vmem:[%s2488_s22 + $0x2e0] sm:$0xff]  ;;  %756 = vmatprep.subr.mxu0 %v655_v4  ;;  %v717_v9 = vld [vmem:[%s2488_s22 + $0x2d8] sm:$0xff]  ;;  %v716_v11 = vld [vmem:[%s2488_s22 + $0x2d0] sm:$0xff] }
  0x81   : > { %917 = vmatprep.subr.mxu1 %v719_v5  ;;  %757 = vmatpush1.msra.mxu0 %v654_v6  ;;  %v651_v12 = vld [vmem:[%s2488_s22 + $0xc8] sm:$0xff]  ;;  %v650_v14 = vld [vmem:[%s2488_s22 + $0xc0] sm:$0xff]  ;;  %v649_v16 = vld [vmem:[%s2488_s22 + $0xb8] sm:$0xff] }
  0x82   : > { %918 = vmatpush1.msra.mxu1 %v718_v7  ;;  %v715_v13 = vld [vmem:[%s2488_s22 + $0x2c8] sm:$0xff]  ;;  %758 = vmatprep.subr.mxu0 %v653_v8  ;;  %v714_v15 = vld [vmem:[%s2488_s22 + $0x2c0] sm:$0xff]  ;;  %v713_v17 = vld [vmem:[%s2488_s22 + $0x2b8] sm:$0xff] }
  0x83   : > { %919 = vmatprep.subr.mxu1 %v717_v9  ;;  %759 = vmatpush1.msra.mxu0 %v652_v10  ;;  %v648_v18 = vld [vmem:[%s2488_s22 + $0xb0] sm:$0xff]  ;;  %v647_v20 = vld [vmem:[%s2488_s22 + $0xa8] sm:$0xff]  ;;  %v646_v22 = vld [vmem:[%s2488_s22 + $0xa0] sm:$0xff] }
  0x84   : > { %920 = vmatpush1.msra.mxu1 %v716_v11  ;;  %760 = vmatprep.subr.mxu0 %v651_v12  ;;  %v712_v19 = vld [vmem:[%s2488_s22 + $0x2b0] sm:$0xff]  ;;  %v711_v21 = vld [vmem:[%s2488_s22 + $0x2a8] sm:$0xff]  ;;  %v710_v23 = vld [vmem:[%s2488_s22 + $0x2a0] sm:$0xff] }
  0x85   : > { %921 = vmatprep.subr.mxu1 %v715_v13  ;;  %761 = vmatpush1.msra.mxu0 %v650_v14  ;;  %v645_v24 = vld [vmem:[%s2488_s22 + $0x98] sm:$0xff]  ;;  %v644_v26 = vld [vmem:[%s2488_s22 + $0x90] sm:$0xff]  ;;  %v643_v28 = vld [vmem:[%s2488_s22 + $0x88] sm:$0xff] }
  0x86   : > { %922 = vmatpush1.msra.mxu1 %v714_v15  ;;  %762 = vmatprep.subr.mxu0 %v649_v16  ;;  %v709_v25 = vld [vmem:[%s2488_s22 + $0x298] sm:$0xff]  ;;  %v708_v27 = vld [vmem:[%s2488_s22 + $0x290] sm:$0xff]  ;;  %v707_v29 = vld [vmem:[%s2488_s22 + $0x288] sm:$0xff] }
  0x87   : > { %923 = vmatprep.subr.mxu1 %v713_v17  ;;  %763 = vmatpush1.msra.mxu0 %v648_v18  ;;  %v642_v30 = vld [vmem:[%s2488_s22 + $0x80] sm:$0xff]  ;;  %v641_v32 = vld [vmem:[%s2488_s22 + $0x78] sm:$0xff]  ;;  %v640_v34 = vld [vmem:[%s2488_s22 + $0x70] sm:$0xff] }
  0x88   : > { %924 = vmatpush1.msra.mxu1 %v712_v19  ;;  %764 = vmatprep.subr.mxu0 %v647_v20  ;;  %v706_v31 = vld [vmem:[%s2488_s22 + $0x280] sm:$0xff]  ;;  %v705_v33 = vld [vmem:[%s2488_s22 + $0x278] sm:$0xff]  ;;  %v704_v35 = vld [vmem:[%s2488_s22 + $0x270] sm:$0xff] }
  0x89   : > { %925 = vmatprep.subr.mxu1 %v711_v21  ;;  %765 = vmatpush1.msra.mxu0 %v646_v22  ;;  %v639_v36 = vld [vmem:[%s2488_s22 + $0x68] sm:$0xff]  ;;  %v638_v38 = vld [vmem:[%s2488_s22 + $0x60] sm:$0xff]  ;;  %v637_v40 = vld [vmem:[%s2488_s22 + $0x58] sm:$0xff] }
  0x8a   : > { %926 = vmatpush1.msra.mxu1 %v710_v23  ;;  %766 = vmatprep.subr.mxu0 %v645_v24  ;;  %v703_v37 = vld [vmem:[%s2488_s22 + $0x268] sm:$0xff]  ;;  %v702_v39 = vld [vmem:[%s2488_s22 + $0x260] sm:$0xff]  ;;  %v701_v41 = vld [vmem:[%s2488_s22 + $0x258] sm:$0xff] }
  0x8b   : > { %927 = vmatprep.subr.mxu1 %v709_v25  ;;  %767 = vmatpush1.msra.mxu0 %v644_v26  ;;  %v636_v42 = vld [vmem:[%s2488_s22 + $0x50] sm:$0xff]  ;;  %v635_v44 = vld [vmem:[%s2488_s22 + $0x48] sm:$0xff]  ;;  %v634_v46 = vld [vmem:[%s2488_s22 + $0x40] sm:$0xff] }
  0x8c   : > { %928 = vmatpush1.msra.mxu1 %v708_v27  ;;  %768 = vmatprep.subr.mxu0 %v643_v28  ;;  %v700_v43 = vld [vmem:[%s2488_s22 + $0x250] sm:$0xff]  ;;  %v699_v45 = vld [vmem:[%s2488_s22 + $0x248] sm:$0xff]  ;;  %v698_v47 = vld [vmem:[%s2488_s22 + $0x240] sm:$0xff] }
  0x8d   : > { %929 = vmatprep.subr.mxu1 %v707_v29  ;;  %769 = vmatpush1.msra.mxu0 %v642_v30  ;;  %v633_v48 = vld [vmem:[%s2488_s22 + $0x38] sm:$0xff]  ;;  %v632_v50 = vld [vmem:[%s2488_s22 + $0x30] sm:$0xff]  ;;  %v631_v52 = vld [vmem:[%s2488_s22 + $0x28] sm:$0xff] }
  0x8e   : > { %930 = vmatpush1.msra.mxu1 %v706_v31  ;;  %770 = vmatprep.subr.mxu0 %v641_v32  ;;  %v697_v49 = vld [vmem:[%s2488_s22 + $0x238] sm:$0xff]  ;;  %v696_v51 = vld [vmem:[%s2488_s22 + $0x230] sm:$0xff]  ;;  %v695_v53 = vld [vmem:[%s2488_s22 + $0x228] sm:$0xff] }
  0x8f   : > { %931 = vmatprep.subr.mxu1 %v705_v33  ;;  %771 = vmatpush1.msra.mxu0 %v640_v34  ;;  %v630_v54 = vld [vmem:[%s2488_s22 + $0x20] sm:$0xff]  ;;  %v629_v56 = vld [vmem:[%s2488_s22 + $0x18] sm:$0xff]  ;;  %v628_v58 = vld [vmem:[%s2488_s22 + $0x10] sm:$0xff] }
  0x90   : > { %932 = vmatpush1.msra.mxu1 %v704_v35  ;;  %772 = vmatprep.subr.mxu0 %v639_v36  ;;  %v694_v55 = vld [vmem:[%s2488_s22 + $0x220] sm:$0xff]  ;;  %v693_v57 = vld [vmem:[%s2488_s22 + $0x218] sm:$0xff]  ;;  %v692_v59 = vld [vmem:[%s2488_s22 + $0x210] sm:$0xff] }
  0x91   : > { %933 = vmatprep.subr.mxu1 %v703_v37  ;;  %773 = vmatpush1.msra.mxu0 %v638_v38  ;;  %v627_v60 = vld [vmem:[%s2488_s22 + $0x8] sm:$0xff]  ;;  %v626_v62 = vld [vmem:[%s2488_s22] sm:$0xff]  ;;  %v689_v0 = vld [vmem:[%s2488_s22 + $0x1f8] sm:$0xff] }
  0x92   : > { %934 = vmatpush1.msra.mxu1 %v702_v39  ;;  %774 = vmatprep.subr.mxu0 %v637_v40  ;;  %v691_v61 = vld [vmem:[%s2488_s22 + $0x208] sm:$0xff]  ;;  %v690_v63 = vld [vmem:[%s2488_s22 + $0x200] sm:$0xff]  ;;  %v753_v1 = vld [vmem:[%s2488_s22 + $0x3f8] sm:$0xff] }
  0x93   : > { %935 = vmatprep.subr.mxu1 %v701_v41  ;;  %775 = vmatpush1.msra.mxu0 %v636_v42  ;;  %v688_v2 = vld [vmem:[%s2488_s22 + $0x1f0] sm:$0xff]  ;;  %v687_v4 = vld [vmem:[%s2488_s22 + $0x1e8] sm:$0xff]  ;;  %v686_v6 = vld [vmem:[%s2488_s22 + $0x1e0] sm:$0xff] }
  0x94   : > { %936 = vmatpush1.msra.mxu1 %v700_v43  ;;  %776 = vmatprep.subr.mxu0 %v635_v44  ;;  %v752_v3 = vld [vmem:[%s2488_s22 + $0x3f0] sm:$0xff]  ;;  %v751_v5 = vld [vmem:[%s2488_s22 + $0x3e8] sm:$0xff]  ;;  %v750_v7 = vld [vmem:[%s2488_s22 + $0x3e0] sm:$0xff] }
  0x95   : > { %937 = vmatprep.subr.mxu1 %v699_v45  ;;  %777 = vmatpush1.msra.mxu0 %v634_v46  ;;  %v685_v8 = vld [vmem:[%s2488_s22 + $0x1d8] sm:$0xff]  ;;  %v684_v10 = vld [vmem:[%s2488_s22 + $0x1d0] sm:$0xff]  ;;  %v683_v12 = vld [vmem:[%s2488_s22 + $0x1c8] sm:$0xff] }
  0x96   : > { %938 = vmatpush1.msra.mxu1 %v698_v47  ;;  %778 = vmatprep.subr.mxu0 %v633_v48  ;;  %v749_v9 = vld [vmem:[%s2488_s22 + $0x3d8] sm:$0xff]  ;;  %v748_v11 = vld [vmem:[%s2488_s22 + $0x3d0] sm:$0xff]  ;;  %v747_v13 = vld [vmem:[%s2488_s22 + $0x3c8] sm:$0xff] }
  0x97   : > { %939 = vmatprep.subr.mxu1 %v697_v49  ;;  %779 = vmatpush1.msra.mxu0 %v632_v50  ;;  %v682_v14 = vld [vmem:[%s2488_s22 + $0x1c0] sm:$0xff]  ;;  %v681_v16 = vld [vmem:[%s2488_s22 + $0x1b8] sm:$0xff]  ;;  %v680_v18 = vld [vmem:[%s2488_s22 + $0x1b0] sm:$0xff] }
  0x98   : > { %940 = vmatpush1.msra.mxu1 %v696_v51  ;;  %780 = vmatprep.subr.mxu0 %v631_v52  ;;  %v746_v15 = vld [vmem:[%s2488_s22 + $0x3c0] sm:$0xff]  ;;  %v745_v17 = vld [vmem:[%s2488_s22 + $0x3b8] sm:$0xff]  ;;  %v744_v19 = vld [vmem:[%s2488_s22 + $0x3b0] sm:$0xff] }
  0x99   : > { %941 = vmatprep.subr.mxu1 %v695_v53  ;;  %781 = vmatpush1.msra.mxu0 %v630_v54  ;;  %v679_v20 = vld [vmem:[%s2488_s22 + $0x1a8] sm:$0xff]  ;;  %v678_v22 = vld [vmem:[%s2488_s22 + $0x1a0] sm:$0xff]  ;;  %v677_v24 = vld [vmem:[%s2488_s22 + $0x198] sm:$0xff] }
  0x9a   : > { %942 = vmatpush1.msra.mxu1 %v694_v55  ;;  %782 = vmatprep.subr.mxu0 %v629_v56  ;;  %v743_v21 = vld [vmem:[%s2488_s22 + $0x3a8] sm:$0xff]  ;;  %v742_v23 = vld [vmem:[%s2488_s22 + $0x3a0] sm:$0xff]  ;;  %v741_v25 = vld [vmem:[%s2488_s22 + $0x398] sm:$0xff] }
  0x9b   : > { %943 = vmatprep.subr.mxu1 %v693_v57  ;;  %783 = vmatpush1.msra.mxu0 %v628_v58  ;;  %v676_v26 = vld [vmem:[%s2488_s22 + $0x190] sm:$0xff]  ;;  %v675_v28 = vld [vmem:[%s2488_s22 + $0x188] sm:$0xff]  ;;  %v674_v30 = vld [vmem:[%s2488_s22 + $0x180] sm:$0xff] }
  0x9c   : > { %944 = vmatpush1.msra.mxu1 %v692_v59  ;;  %784 = vmatprep.subr.mxu0 %v627_v60  ;;  %v740_v27 = vld [vmem:[%s2488_s22 + $0x390] sm:$0xff]  ;;  %v739_v29 = vld [vmem:[%s2488_s22 + $0x388] sm:$0xff]  ;;  %v738_v31 = vld [vmem:[%s2488_s22 + $0x380] sm:$0xff] }
  0x9d   : > { %945 = vmatprep.subr.mxu1 %v691_v61  ;;  %785 = vmatpush1.msra.mxu0 %v626_v62  ;;  %v673_v32 = vld [vmem:[%s2488_s22 + $0x178] sm:$0xff]  ;;  %v672_v34 = vld [vmem:[%s2488_s22 + $0x170] sm:$0xff]  ;;  %v671_v36 = vld [vmem:[%s2488_s22 + $0x168] sm:$0xff] }
  0x9e   : > { %946 = vmatpush1.msra.mxu1 %v690_v63  ;;  %786 = vmatprep.subr.mxu0 %v689_v0  ;;  %v737_v33 = vld [vmem:[%s2488_s22 + $0x378] sm:$0xff]  ;;  %v736_v35 = vld [vmem:[%s2488_s22 + $0x370] sm:$0xff]  ;;  %v735_v37 = vld [vmem:[%s2488_s22 + $0x368] sm:$0xff] }
  0x9f   : > { %947 = vmatprep.subr.mxu1 %v753_v1  ;;  %787 = vmatpush2.msra.mxu0 %v688_v2  ;;  %v670_v38 = vld [vmem:[%s2488_s22 + $0x160] sm:$0xff]  ;;  %v669_v40 = vld [vmem:[%s2488_s22 + $0x158] sm:$0xff]  ;;  %v668_v42 = vld [vmem:[%s2488_s22 + $0x150] sm:$0xff] }
  0xa0   : > { %948 = vmatpush2.msra.mxu1 %v752_v3  ;;  %788 = vmatprep.subr.mxu0 %v687_v4  ;;  %v734_v39 = vld [vmem:[%s2488_s22 + $0x360] sm:$0xff]  ;;  %v733_v41 = vld [vmem:[%s2488_s22 + $0x358] sm:$0xff]  ;;  %v732_v43 = vld [vmem:[%s2488_s22 + $0x350] sm:$0xff] }
  0xa1   : > { %949 = vmatprep.subr.mxu1 %v751_v5  ;;  %789 = vmatpush2.msra.mxu0 %v686_v6  ;;  %v667_v44 = vld [vmem:[%s2488_s22 + $0x148] sm:$0xff]  ;;  %v666_v46 = vld [vmem:[%s2488_s22 + $0x140] sm:$0xff]  ;;  %v665_v48 = vld [vmem:[%s2488_s22 + $0x138] sm:$0xff] }
  0xa2   : > { %950 = vmatpush2.msra.mxu1 %v750_v7  ;;  %790 = vmatprep.subr.mxu0 %v685_v8  ;;  %v731_v45 = vld [vmem:[%s2488_s22 + $0x348] sm:$0xff]  ;;  %v730_v47 = vld [vmem:[%s2488_s22 + $0x340] sm:$0xff]  ;;  %v729_v49 = vld [vmem:[%s2488_s22 + $0x338] sm:$0xff] }
  0xa3   : > { %951 = vmatprep.subr.mxu1 %v749_v9  ;;  %791 = vmatpush2.msra.mxu0 %v684_v10  ;;  %v664_v50 = vld [vmem:[%s2488_s22 + $0x130] sm:$0xff]  ;;  %v663_v52 = vld [vmem:[%s2488_s22 + $0x128] sm:$0xff]  ;;  %v662_v54 = vld [vmem:[%s2488_s22 + $0x120] sm:$0xff] }
  0xa4   : > { %952 = vmatpush2.msra.mxu1 %v748_v11  ;;  %792 = vmatprep.subr.mxu0 %v683_v12  ;;  %v728_v51 = vld [vmem:[%s2488_s22 + $0x330] sm:$0xff]  ;;  %v727_v53 = vld [vmem:[%s2488_s22 + $0x328] sm:$0xff]  ;;  %v726_v55 = vld [vmem:[%s2488_s22 + $0x320] sm:$0xff] }
  0xa5   : > { %953 = vmatprep.subr.mxu1 %v747_v13  ;;  %793 = vmatpush2.msra.mxu0 %v682_v14  ;;  %v661_v56 = vld [vmem:[%s2488_s22 + $0x118] sm:$0xff]  ;;  %v660_v58 = vld [vmem:[%s2488_s22 + $0x110] sm:$0xff]  ;;  %v659_v60 = vld [vmem:[%s2488_s22 + $0x108] sm:$0xff] }
  0xa6   : > { %954 = vmatpush2.msra.mxu1 %v746_v15  ;;  %794 = vmatprep.subr.mxu0 %v681_v16  ;;  %v725_v57 = vld [vmem:[%s2488_s22 + $0x318] sm:$0xff]  ;;  %v724_v59 = vld [vmem:[%s2488_s22 + $0x310] sm:$0xff]  ;;  %v723_v61 = vld [vmem:[%s2488_s22 + $0x308] sm:$0xff] }
  0xa7   : > { %955 = vmatprep.subr.mxu1 %v745_v17  ;;  %795 = vmatpush2.msra.mxu0 %v680_v18  ;;  %v658_v62 = vld [vmem:[%s2488_s22 + $0x100] sm:$0xff]  ;;  %v563_v63 = vld [vmem:[%s2479_s9 + $0x8] sm:$0xff]  ;;  %v565_v1 = vld [vmem:[%s2479_s9 + $0x18] sm:$0xff] }
  0xa8   : > { %956 = vmatpush2.msra.mxu1 %v744_v19  ;;  %796 = vmatprep.subr.mxu0 %v679_v20  ;;  %v722_v0 = vld [vmem:[%s2488_s22 + $0x300] sm:$0xff]  ;;  %v564_v3 = vld [vmem:[%s2479_s9 + $0x10] sm:$0xff]  ;;  %v567_v4 = vld [vmem:[%s2479_s9 + $0x28] sm:$0xff] }
  0xa9   : > { %957 = vmatprep.subr.mxu1 %v743_v21  ;;  %797 = vmatpush2.msra.mxu0 %v678_v22  ;;  %v562_v2 = vld [vmem:[%s2479_s9] sm:$0xff]  ;;  %v569_v5 = vld [vmem:[%s2479_s9 + $0x38] sm:$0xff]  ;;  %v568_v7 = vld [vmem:[%s2479_s9 + $0x30] sm:$0xff] }
  0xaa   : > { %958 = vmatpush2.msra.mxu1 %v742_v23  ;;  %798 = vmatprep.subr.mxu0 %v677_v24  ;;  %v566_v6 = vld [vmem:[%s2479_s9 + $0x20] sm:$0xff]  ;;  %v571_v8 = vld [vmem:[%s2479_s9 + $0x48] sm:$0xff]  ;;  %v573_v9 = vld [vmem:[%s2479_s9 + $0x58] sm:$0xff] }
  0xab   : > { %959 = vmatprep.subr.mxu1 %v741_v25  ;;  %799 = vmatpush2.msra.mxu0 %v676_v26  ;;  %v570_v10 = vld [vmem:[%s2479_s9 + $0x40] sm:$0xff]  ;;  %v572_v11 = vld [vmem:[%s2479_s9 + $0x50] sm:$0xff]  ;;  %v575_v12 = vld [vmem:[%s2479_s9 + $0x68] sm:$0xff] }
  0xac   : > { %960 = vmatpush2.msra.mxu1 %v740_v27  ;;  %800 = vmatprep.subr.mxu0 %v675_v28  ;;  %v577_v13 = vld [vmem:[%s2479_s9 + $0x78] sm:$0xff]  ;;  %v574_v14 = vld [vmem:[%s2479_s9 + $0x60] sm:$0xff]  ;;  %v576_v15 = vld [vmem:[%s2479_s9 + $0x70] sm:$0xff] }
  0xad   : > { %961 = vmatprep.subr.mxu1 %v739_v29  ;;  %801 = vmatpush2.msra.mxu0 %v674_v30  ;;  %v579_v16 = vld [vmem:[%s2479_s9 + $0x88] sm:$0xff]  ;;  %v581_v17 = vld [vmem:[%s2479_s9 + $0x98] sm:$0xff]  ;;  %v578_v18 = vld [vmem:[%s2479_s9 + $0x80] sm:$0xff] }
  0xae   : > { %962 = vmatpush2.msra.mxu1 %v738_v31  ;;  %802 = vmatprep.subr.mxu0 %v673_v32  ;;  %v580_v19 = vld [vmem:[%s2479_s9 + $0x90] sm:$0xff]  ;;  %v583_v20 = vld [vmem:[%s2479_s9 + $0xa8] sm:$0xff]  ;;  %v585_v21 = vld [vmem:[%s2479_s9 + $0xb8] sm:$0xff] }
  0xaf   : > { %963 = vmatprep.subr.mxu1 %v737_v33  ;;  %803 = vmatpush2.msra.mxu0 %v672_v34  ;;  %v582_v22 = vld [vmem:[%s2479_s9 + $0xa0] sm:$0xff]  ;;  %v584_v23 = vld [vmem:[%s2479_s9 + $0xb0] sm:$0xff]  ;;  %v587_v24 = vld [vmem:[%s2479_s9 + $0xc8] sm:$0xff] }
  0xb0   : > { %964 = vmatpush2.msra.mxu1 %v736_v35  ;;  %804 = vmatprep.subr.mxu0 %v671_v36  ;;  %v589_v25 = vld [vmem:[%s2479_s9 + $0xd8] sm:$0xff]  ;;  %v586_v26 = vld [vmem:[%s2479_s9 + $0xc0] sm:$0xff]  ;;  %v588_v27 = vld [vmem:[%s2479_s9 + $0xd0] sm:$0xff] }
  0xb1   : > { %965 = vmatprep.subr.mxu1 %v735_v37  ;;  %805 = vmatpush2.msra.mxu0 %v670_v38  ;;  %v591_v28 = vld [vmem:[%s2479_s9 + $0xe8] sm:$0xff]  ;;  %v593_v29 = vld [vmem:[%s2479_s9 + $0xf8] sm:$0xff]  ;;  %v590_v30 = vld [vmem:[%s2479_s9 + $0xe0] sm:$0xff] }
  0xb2   : > { %966 = vmatpush2.msra.mxu1 %v734_v39  ;;  %806 = vmatprep.subr.mxu0 %v669_v40  ;;  %v592_v31 = vld [vmem:[%s2479_s9 + $0xf0] sm:$0xff]  ;;  %v595_v32 = vld [vmem:[%s2479_s9 + $0x108] sm:$0xff]  ;;  %v597_v33 = vld [vmem:[%s2479_s9 + $0x118] sm:$0xff] }
  0xb3   : > { %967 = vmatprep.subr.mxu1 %v733_v41  ;;  %807 = vmatpush2.msra.mxu0 %v668_v42  ;;  %v594_v34 = vld [vmem:[%s2479_s9 + $0x100] sm:$0xff]  ;;  %v596_v35 = vld [vmem:[%s2479_s9 + $0x110] sm:$0xff]  ;;  %v599_v36 = vld [vmem:[%s2479_s9 + $0x128] sm:$0xff] }
  0xb4   : > { %968 = vmatpush2.msra.mxu1 %v732_v43  ;;  %808 = vmatprep.subr.mxu0 %v667_v44  ;;  %v601_v37 = vld [vmem:[%s2479_s9 + $0x138] sm:$0xff]  ;;  %v598_v38 = vld [vmem:[%s2479_s9 + $0x120] sm:$0xff]  ;;  %v600_v39 = vld [vmem:[%s2479_s9 + $0x130] sm:$0xff] }
  0xb5   : > { %969 = vmatprep.subr.mxu1 %v731_v45  ;;  %809 = vmatpush2.msra.mxu0 %v666_v46  ;;  %v603_v40 = vld [vmem:[%s2479_s9 + $0x148] sm:$0xff]  ;;  %v605_v41 = vld [vmem:[%s2479_s9 + $0x158] sm:$0xff]  ;;  %v602_v42 = vld [vmem:[%s2479_s9 + $0x140] sm:$0xff] }
  0xb6   : > { %970 = vmatpush2.msra.mxu1 %v730_v47  ;;  %810 = vmatprep.subr.mxu0 %v665_v48  ;;  %v604_v43 = vld [vmem:[%s2479_s9 + $0x150] sm:$0xff]  ;;  %v607_v44 = vld [vmem:[%s2479_s9 + $0x168] sm:$0xff]  ;;  %v609_v45 = vld [vmem:[%s2479_s9 + $0x178] sm:$0xff] }
  0xb7   : > { %971 = vmatprep.subr.mxu1 %v729_v49  ;;  %811 = vmatpush2.msra.mxu0 %v664_v50  ;;  %v606_v46 = vld [vmem:[%s2479_s9 + $0x160] sm:$0xff]  ;;  %v608_v47 = vld [vmem:[%s2479_s9 + $0x170] sm:$0xff]  ;;  %v611_v48 = vld [vmem:[%s2479_s9 + $0x188] sm:$0xff] }
  0xb8   : > { %972 = vmatpush2.msra.mxu1 %v728_v51  ;;  %812 = vmatprep.subr.mxu0 %v663_v52  ;;  %v613_v49 = vld [vmem:[%s2479_s9 + $0x198] sm:$0xff]  ;;  %v610_v50 = vld [vmem:[%s2479_s9 + $0x180] sm:$0xff]  ;;  %v612_v51 = vld [vmem:[%s2479_s9 + $0x190] sm:$0xff] }
  0xb9   : > { %973 = vmatprep.subr.mxu1 %v727_v53  ;;  %813 = vmatpush2.msra.mxu0 %v662_v54  ;;  %v615_v52 = vld [vmem:[%s2479_s9 + $0x1a8] sm:$0xff]  ;;  %v617_v53 = vld [vmem:[%s2479_s9 + $0x1b8] sm:$0xff]  ;;  %v614_v54 = vld [vmem:[%s2479_s9 + $0x1a0] sm:$0xff] }
  0xba   : > { %974 = vmatpush2.msra.mxu1 %v726_v55  ;;  %814 = vmatprep.subr.mxu0 %v661_v56  ;;  %v616_v55 = vld [vmem:[%s2479_s9 + $0x1b0] sm:$0xff]  ;;  %v619_v56 = vld [vmem:[%s2479_s9 + $0x1c8] sm:$0xff] }
  0xbb   : > { %975 = vmatprep.subr.mxu1 %v725_v57  ;;  %815 = vmatpush2.msra.mxu0 %v660_v58  ;;  %v621_v57 = vld [vmem:[%s2479_s9 + $0x1d8] sm:$0xff]  ;;  %v618_v58 = vld [vmem:[%s2479_s9 + $0x1c0] sm:$0xff] }
  0xbc   : > { %976 = vmatpush2.msra.mxu1 %v724_v59  ;;  %816 = vmatprep.subr.mxu0 %v659_v60  ;;  %v620_v59 = vld [vmem:[%s2479_s9 + $0x1d0] sm:$0xff]  ;;  %v623_v60 = vld [vmem:[%s2479_s9 + $0x1e8] sm:$0xff] }
  0xbd   : > { %977 = vmatprep.subr.mxu1 %v723_v61  ;;  %817 = vmatpush2.msra.mxu0 %v658_v62  ;;  %v625_v61 = vld [vmem:[%s2479_s9 + $0x1f8] sm:$0xff]  ;;  %v622_v62 = vld [vmem:[%s2479_s9 + $0x1e0] sm:$0xff] }
  0xbe   : > { %818 = vmatprep.mubr.f32.mxu0 %v563_v63  ;;  %978 = vmatpush2.msra.mxu1 %v722_v0  ;;  %v624_v63 = vld [vmem:[%s2479_s9 + $0x1f0] sm:$0xff] }
  0xbf   : > { %979 = vmatprep.mubr.f32.mxu1 %v565_v1  ;;  %819 = vmatmul.mubr.f32.vlgmr.msra.gmra.mxu0 %v562_v2 }
  0xc0   : > { %980 = vmatmul.mubr.f32.vlgmr.msra.gmra.mxu1 %v564_v3  ;;  %824 = vmatprep.mubr.f32.mxu0 %v567_v4 }
  0xc1   : > { %985 = vmatprep.mubr.f32.mxu1 %v569_v5 }
  0xc3   : > { %825 = vmatmul.mubr.f32.gmra.mxu0 %v566_v6 }
  0xc4   : > { %986 = vmatmul.mubr.f32.gmra.mxu1 %v568_v7  ;;  %830 = vmatprep.mubr.f32.mxu0 %v571_v8 }
  0xc5   : > { %991 = vmatprep.mubr.f32.mxu1 %v573_v9 }
  0xc7   : > { %831 = vmatmul.mubr.f32.gmra.mxu0 %v570_v10 }
  0xc8   : > { %992 = vmatmul.mubr.f32.gmra.mxu1 %v572_v11  ;;  %836 = vmatprep.mubr.f32.mxu0 %v575_v12 }
  0xc9   : > { %997 = vmatprep.mubr.f32.mxu1 %v577_v13 }
  0xcb   : > { %837 = vmatmul.mubr.f32.gmra.mxu0 %v574_v14 }
  0xcc   : > { %998 = vmatmul.mubr.f32.gmra.mxu1 %v576_v15  ;;  %842 = vmatprep.mubr.f32.mxu0 %v579_v16 }
  0xcd   : > { %1003 = vmatprep.mubr.f32.mxu1 %v581_v17 }
  0xcf   : > { %843 = vmatmul.mubr.f32.gmra.mxu0 %v578_v18 }
  0xd0   : > { %1004 = vmatmul.mubr.f32.gmra.mxu1 %v580_v19  ;;  %848 = vmatprep.mubr.f32.mxu0 %v583_v20 }
  0xd1   : > { %1009 = vmatprep.mubr.f32.mxu1 %v585_v21 }
  0xd3   : > { %849 = vmatmul.mubr.f32.gmra.mxu0 %v582_v22 }
  0xd4   : > { %1010 = vmatmul.mubr.f32.gmra.mxu1 %v584_v23  ;;  %854 = vmatprep.mubr.f32.mxu0 %v587_v24 }
  0xd5   : > { %1015 = vmatprep.mubr.f32.mxu1 %v589_v25 }
  0xd7   : > { %855 = vmatmul.mubr.f32.gmra.mxu0 %v586_v26 }
  0xd8   : > { %1016 = vmatmul.mubr.f32.gmra.mxu1 %v588_v27  ;;  %860 = vmatprep.mubr.f32.mxu0 %v591_v28 }
  0xd9   : > { %1021 = vmatprep.mubr.f32.mxu1 %v593_v29 }
  0xdb   : > { %861 = vmatmul.mubr.f32.gmra.mxu0 %v590_v30 }
  0xdc   : > { %1022 = vmatmul.mubr.f32.gmra.mxu1 %v592_v31  ;;  %866 = vmatprep.mubr.f32.mxu0 %v595_v32 }
  0xdd   : > { %1027 = vmatprep.mubr.f32.mxu1 %v597_v33 }
  0xdf   : > { %867 = vmatmul.mubr.f32.gmra.mxu0 %v594_v34 }
  0xe0   : > { %1028 = vmatmul.mubr.f32.gmra.mxu1 %v596_v35  ;;  %872 = vmatprep.mubr.f32.mxu0 %v599_v36 }
  0xe1   : > { %1033 = vmatprep.mubr.f32.mxu1 %v601_v37 }
  0xe3   : > { %873 = vmatmul.mubr.f32.gmra.mxu0 %v598_v38 }
  0xe4   : > { %1034 = vmatmul.mubr.f32.gmra.mxu1 %v600_v39  ;;  %878 = vmatprep.mubr.f32.mxu0 %v603_v40 }
  0xe5   : > { %1039 = vmatprep.mubr.f32.mxu1 %v605_v41 }
  0xe7   : > { %879 = vmatmul.mubr.f32.gmra.mxu0 %v602_v42 }
  0xe8   : > { %1040 = vmatmul.mubr.f32.gmra.mxu1 %v604_v43  ;;  %884 = vmatprep.mubr.f32.mxu0 %v607_v44 }
  0xe9   : > { %1045 = vmatprep.mubr.f32.mxu1 %v609_v45 }
  0xeb   : > { %885 = vmatmul.mubr.f32.gmra.mxu0 %v606_v46 }
  0xec   : > { %1046 = vmatmul.mubr.f32.gmra.mxu1 %v608_v47  ;;  %890 = vmatprep.mubr.f32.mxu0 %v611_v48 }
  0xed   : > { %1051 = vmatprep.mubr.f32.mxu1 %v613_v49 }
  0xef   : > { %891 = vmatmul.mubr.f32.gmra.mxu0 %v610_v50 }
  0xf0   : > { %1052 = vmatmul.mubr.f32.gmra.mxu1 %v612_v51  ;;  %896 = vmatprep.mubr.f32.mxu0 %v615_v52 }
  0xf1   : > { %1057 = vmatprep.mubr.f32.mxu1 %v617_v53 }
  0xf3   : > { %897 = vmatmul.mubr.f32.gmra.mxu0 %v614_v54 }
  0xf4   : > { %1058 = vmatmul.mubr.f32.gmra.mxu1 %v616_v55  ;;  %902 = vmatprep.mubr.f32.mxu0 %v619_v56 }
  0xf5   : > { %1063 = vmatprep.mubr.f32.mxu1 %v621_v57 }
  0xf7   : > { %903 = vmatmul.mubr.f32.gmra.mxu0 %v618_v58 }
  0xf8   : > { %1064 = vmatmul.mubr.f32.gmra.mxu1 %v620_v59  ;;  %908 = vmatprep.mubr.f32.mxu0 %v623_v60 }
  0xf9   : > { %1069 = vmatprep.mubr.f32.mxu1 %v625_v61 }
  0xfb   : > { %909 = vmatmul.mubr.f32.gmra.mxu0 %v622_v62 }
  0xfc   : > { %1070 = vmatmul.mubr.f32.gmra.mxu1 %v624_v63 }
 0x17f   : > { %v820_v0 = vpop.f32.mrf.mxu0 }
 0x180   : > { %v981_v1 = vpop.f32.mrf.mxu1 }
 0x181   : > { %v982_v2 = vadd.f32 %v981_v1, %v820_v0  ;;  %v822_v3 = vpop.f32.mrf.mxu0 }
 0x182   : > { %v983_v4 = vpop.f32.mrf.mxu1 }
 0x183   : > { %1079 = vst [vmem:[%s2688_s4] sm:$0xff] %v982_v2  ;;  %v984_v5 = vadd.f32 %v983_v4, %v822_v3  ;;  %v826_v6 = vpop.f32.mrf.mxu0 }
 0x184   : > { %v987_v7 = vpop.f32.mrf.mxu1 }
 0x185   : > { %1080 = vst [vmem:[%s2688_s4 + $0x8] sm:$0xff] %v984_v5  ;;  %v988_v8 = vadd.f32 %v987_v7, %v826_v6  ;;  %v828_v9 = vpop.f32.mrf.mxu0 }
 0x186   : > { %v989_v10 = vpop.f32.mrf.mxu1 }
 0x187   : > { %1081 = vst [vmem:[%s2688_s4 + $0x10] sm:$0xff] %v988_v8  ;;  %v990_v11 = vadd.f32 %v989_v10, %v828_v9  ;;  %v832_v12 = vpop.f32.mrf.mxu0 }
 0x188   : > { %v993_v13 = vpop.f32.mrf.mxu1 }
 0x189   : > { %1082 = vst [vmem:[%s2688_s4 + $0x18] sm:$0xff] %v990_v11  ;;  %v994_v14 = vadd.f32 %v993_v13, %v832_v12  ;;  %v834_v15 = vpop.f32.mrf.mxu0 }
 0x18a   : > { %v995_v16 = vpop.f32.mrf.mxu1 }
 0x18b   : > { %1083 = vst [vmem:[%s2688_s4 + $0x20] sm:$0xff] %v994_v14  ;;  %v996_v17 = vadd.f32 %v995_v16, %v834_v15  ;;  %v838_v18 = vpop.f32.mrf.mxu0 }
 0x18c   : > { %v999_v19 = vpop.f32.mrf.mxu1 }
 0x18d   : > { %1084 = vst [vmem:[%s2688_s4 + $0x28] sm:$0xff] %v996_v17  ;;  %v1000_v20 = vadd.f32 %v999_v19, %v838_v18  ;;  %v840_v21 = vpop.f32.mrf.mxu0 }
 0x18e   : > { %v1001_v22 = vpop.f32.mrf.mxu1 }
 0x18f   : > { %1085 = vst [vmem:[%s2688_s4 + $0x30] sm:$0xff] %v1000_v20  ;;  %v1002_v23 = vadd.f32 %v1001_v22, %v840_v21  ;;  %v844_v24 = vpop.f32.mrf.mxu0 }
 0x190   : > { %v1005_v25 = vpop.f32.mrf.mxu1 }
 0x191   : > { %1086 = vst [vmem:[%s2688_s4 + $0x38] sm:$0xff] %v1002_v23  ;;  %v1006_v26 = vadd.f32 %v1005_v25, %v844_v24  ;;  %v846_v27 = vpop.f32.mrf.mxu0 }
 0x192   : > { %v1007_v28 = vpop.f32.mrf.mxu1 }
 0x193   : > { %1087 = vst [vmem:[%s2688_s4 + $0x40] sm:$0xff] %v1006_v26  ;;  %v1008_v29 = vadd.f32 %v1007_v28, %v846_v27  ;;  %v850_v30 = vpop.f32.mrf.mxu0 }
 0x194   : > { %v1011_v31 = vpop.f32.mrf.mxu1 }
 0x195   : > { %1088 = vst [vmem:[%s2688_s4 + $0x48] sm:$0xff] %v1008_v29  ;;  %v1012_v32 = vadd.f32 %v1011_v31, %v850_v30  ;;  %v852_v33 = vpop.f32.mrf.mxu0 }
 0x196   : > { %v1013_v34 = vpop.f32.mrf.mxu1 }
 0x197   : > { %1089 = vst [vmem:[%s2688_s4 + $0x50] sm:$0xff] %v1012_v32  ;;  %v1014_v35 = vadd.f32 %v1013_v34, %v852_v33  ;;  %v856_v36 = vpop.f32.mrf.mxu0 }
 0x198   : > { %v1017_v37 = vpop.f32.mrf.mxu1 }
 0x199   : > { %1090 = vst [vmem:[%s2688_s4 + $0x58] sm:$0xff] %v1014_v35  ;;  %v1018_v38 = vadd.f32 %v1017_v37, %v856_v36  ;;  %v858_v39 = vpop.f32.mrf.mxu0 }
 0x19a   : > { %v1019_v40 = vpop.f32.mrf.mxu1 }
 0x19b   : > { %1091 = vst [vmem:[%s2688_s4 + $0x60] sm:$0xff] %v1018_v38  ;;  %v1020_v41 = vadd.f32 %v1019_v40, %v858_v39  ;;  %v862_v42 = vpop.f32.mrf.mxu0 }
 0x19c   : > { %v1023_v43 = vpop.f32.mrf.mxu1 }
 0x19d   : > { %1092 = vst [vmem:[%s2688_s4 + $0x68] sm:$0xff] %v1020_v41  ;;  %v1024_v44 = vadd.f32 %v1023_v43, %v862_v42  ;;  %v864_v45 = vpop.f32.mrf.mxu0 }
 0x19e   : > { %v1025_v46 = vpop.f32.mrf.mxu1 }
 0x19f   : > { %1093 = vst [vmem:[%s2688_s4 + $0x70] sm:$0xff] %v1024_v44  ;;  %v1026_v47 = vadd.f32 %v1025_v46, %v864_v45  ;;  %v868_v48 = vpop.f32.mrf.mxu0 }
 0x1a0   : > { %v1029_v49 = vpop.f32.mrf.mxu1 }
 0x1a1   : > { %1094 = vst [vmem:[%s2688_s4 + $0x78] sm:$0xff] %v1026_v47  ;;  %v1030_v50 = vadd.f32 %v1029_v49, %v868_v48  ;;  %v870_v51 = vpop.f32.mrf.mxu0 }
 0x1a2   : > { %v1031_v52 = vpop.f32.mrf.mxu1 }
 0x1a3   : > { %1095 = vst [vmem:[%s2688_s4 + $0x80] sm:$0xff] %v1030_v50  ;;  %v1032_v53 = vadd.f32 %v1031_v52, %v870_v51  ;;  %v874_v54 = vpop.f32.mrf.mxu0 }
 0x1a4   : > { %v1035_v55 = vpop.f32.mrf.mxu1 }
 0x1a5   : > { %1096 = vst [vmem:[%s2688_s4 + $0x88] sm:$0xff] %v1032_v53  ;;  %v1036_v56 = vadd.f32 %v1035_v55, %v874_v54  ;;  %v876_v57 = vpop.f32.mrf.mxu0 }
 0x1a6   : > { %v1037_v58 = vpop.f32.mrf.mxu1 }
 0x1a7   : > { %1097 = vst [vmem:[%s2688_s4 + $0x90] sm:$0xff] %v1036_v56  ;;  %v1038_v59 = vadd.f32 %v1037_v58, %v876_v57  ;;  %v880_v60 = vpop.f32.mrf.mxu0 }
 0x1a8   : > { %v1041_v61 = vpop.f32.mrf.mxu1 }
 0x1a9   : > { %1098 = vst [vmem:[%s2688_s4 + $0x98] sm:$0xff] %v1038_v59  ;;  %v1042_v62 = vadd.f32 %v1041_v61, %v880_v60  ;;  %v882_v63 = vpop.f32.mrf.mxu0 }
 0x1aa   : > { %v1043_v0 = vpop.f32.mrf.mxu1 }
 0x1ab   : > { %1099 = vst [vmem:[%s2688_s4 + $0xa0] sm:$0xff] %v1042_v62  ;;  %v1044_v1 = vadd.f32 %v1043_v0, %v882_v63  ;;  %v886_v2 = vpop.f32.mrf.mxu0 }
 0x1ac   : > { %v1047_v3 = vpop.f32.mrf.mxu1 }
 0x1ad   : > { %1100 = vst [vmem:[%s2688_s4 + $0xa8] sm:$0xff] %v1044_v1  ;;  %v1048_v4 = vadd.f32 %v1047_v3, %v886_v2  ;;  %v888_v5 = vpop.f32.mrf.mxu0 }
 0x1ae   : > { %v1049_v6 = vpop.f32.mrf.mxu1 }
 0x1af   : > { %1101 = vst [vmem:[%s2688_s4 + $0xb0] sm:$0xff] %v1048_v4  ;;  %v1050_v7 = vadd.f32 %v1049_v6, %v888_v5  ;;  %v892_v8 = vpop.f32.mrf.mxu0 }
 0x1b0   : > { %v1053_v9 = vpop.f32.mrf.mxu1 }
 0x1b1   : > { %1102 = vst [vmem:[%s2688_s4 + $0xb8] sm:$0xff] %v1050_v7  ;;  %v1054_v10 = vadd.f32 %v1053_v9, %v892_v8  ;;  %v894_v11 = vpop.f32.mrf.mxu0 }
 0x1b2   : > { %v1055_v12 = vpop.f32.mrf.mxu1 }
 0x1b3   : > { %1103 = vst [vmem:[%s2688_s4 + $0xc0] sm:$0xff] %v1054_v10  ;;  %v1056_v13 = vadd.f32 %v1055_v12, %v894_v11  ;;  %v898_v14 = vpop.f32.mrf.mxu0 }
 0x1b4   : > { %v1059_v15 = vpop.f32.mrf.mxu1 }
 0x1b5   : > { %1104 = vst [vmem:[%s2688_s4 + $0xc8] sm:$0xff] %v1056_v13  ;;  %v1060_v16 = vadd.f32 %v1059_v15, %v898_v14  ;;  %v900_v17 = vpop.f32.mrf.mxu0 }
 0x1b6   : > { %v1061_v18 = vpop.f32.mrf.mxu1 }
 0x1b7   : > { %1105 = vst [vmem:[%s2688_s4 + $0xd0] sm:$0xff] %v1060_v16  ;;  %v1062_v19 = vadd.f32 %v1061_v18, %v900_v17  ;;  %v904_v20 = vpop.f32.mrf.mxu0 }
 0x1b8   : > { %v1065_v21 = vpop.f32.mrf.mxu1 }
 0x1b9   : > { %1106 = vst [vmem:[%s2688_s4 + $0xd8] sm:$0xff] %v1062_v19  ;;  %v1066_v22 = vadd.f32 %v1065_v21, %v904_v20  ;;  %v906_v23 = vpop.f32.mrf.mxu0 }
 0x1ba   : > { %v1067_v24 = vpop.f32.mrf.mxu1 }
 0x1bb   : > { %1107 = vst [vmem:[%s2688_s4 + $0xe0] sm:$0xff] %v1066_v22  ;;  %v1068_v25 = vadd.f32 %v1067_v24, %v906_v23  ;;  %v910_v26 = vpop.f32.mrf.mxu0 }
 0x1bc   : > { %v1071_v27 = vpop.f32.mrf.mxu1 }
 0x1bd   : > { %1108 = vst [vmem:[%s2688_s4 + $0xe8] sm:$0xff] %v1068_v25  ;;  %v1072_v28 = vadd.f32 %v1071_v27, %v910_v26  ;;  %v912_v29 = vpop.f32.mrf.mxu0  ;;  %1114 = sbr.rel (%p1738_p7) target bundleno = 467 (0x1d3), region = 67 }
 0x1be   : > { %v1073_v30 = vpop.f32.mrf.mxu1 }
 0x1bf   : > { %1109 = vst [vmem:[%s2688_s4 + $0xf0] sm:$0xff] %v1072_v28  ;;  %v1074_v31 = vadd.f32 %v1073_v30, %v912_v29 }
 0x1c1   : > { %1110 = vst [vmem:[%s2688_s4 + $0xf8] sm:$0xff] %v1074_v31 }
 0x1c2   : > { %v2057_v32 = vmov 0.0  }
 0x1c3   : > { %1115 = vst [vmem:[#allocation2 + $0xb0] sm:$0xff] %v2057_v32  ;;  %1116 = vst [vmem:[#allocation2] sm:$0xff] %v2057_v32 }
 0x1c4   : > { %1117 = vst [vmem:[#allocation2 + $0xd8] sm:$0xff] %v2057_v32  ;;  %1118 = vst [vmem:[#allocation2 + $0x18] sm:$0xff] %v2057_v32 }
 0x1c5   : > { %1119 = vst [vmem:[#allocation2 + $0x50] sm:$0xff] %v2057_v32  ;;  %1120 = vst [vmem:[#allocation2 + $0x68] sm:$0xff] %v2057_v32 }
 0x1c6   : > { %1121 = vst [vmem:[#allocation2 + $0x30] sm:$0xff] %v2057_v32  ;;  %1122 = vst [vmem:[#allocation2 + $0x48] sm:$0xff] %v2057_v32 }
 0x1c7   : > { %1123 = vst [vmem:[#allocation2 + $0x80] sm:$0xff] %v2057_v32  ;;  %1124 = vst [vmem:[#allocation2 + $0x88] sm:$0xff] %v2057_v32 }
 0x1c8   : > { %1125 = vst [vmem:[#allocation2 + $0xe8] sm:$0xff] %v2057_v32  ;;  %1126 = vst [vmem:[#allocation2 + $0xb8] sm:$0xff] %v2057_v32 }
 0x1c9   : > { %1127 = vst [vmem:[#allocation2 + $0x60] sm:$0xff] %v2057_v32  ;;  %1128 = vst [vmem:[#allocation2 + $0xf0] sm:$0xff] %v2057_v32 }
 0x1ca   : > { %1129 = vst [vmem:[#allocation2 + $0x8] sm:$0xff] %v2057_v32  ;;  %1130 = vst [vmem:[#allocation2 + $0x78] sm:$0xff] %v2057_v32 }
 0x1cb   : > { %1131 = vst [vmem:[#allocation2 + $0x38] sm:$0xff] %v2057_v32  ;;  %1132 = vst [vmem:[#allocation2 + $0x58] sm:$0xff] %v2057_v32 }
 0x1cc   : > { %1133 = vst [vmem:[#allocation2 + $0x40] sm:$0xff] %v2057_v32  ;;  %1134 = vst [vmem:[#allocation2 + $0xc8] sm:$0xff] %v2057_v32 }
 0x1cd   : > { %1135 = vst [vmem:[#allocation2 + $0xe0] sm:$0xff] %v2057_v32  ;;  %1136 = vst [vmem:[#allocation2 + $0x90] sm:$0xff] %v2057_v32 }
 0x1ce   : > { %1137 = vst [vmem:[#allocation2 + $0x70] sm:$0xff] %v2057_v32  ;;  %1138 = vst [vmem:[#allocation2 + $0xc0] sm:$0xff] %v2057_v32 }
 0x1cf   : > { %1139 = vst [vmem:[#allocation2 + $0xa8] sm:$0xff] %v2057_v32  ;;  %1140 = vst [vmem:[#allocation2 + $0xd0] sm:$0xff] %v2057_v32 }
 0x1d0   : > { %1141 = vst [vmem:[#allocation2 + $0x10] sm:$0xff] %v2057_v32  ;;  %1142 = vst [vmem:[#allocation2 + $0x28] sm:$0xff] %v2057_v32 }
 0x1d1   : > { %1143 = vst [vmem:[#allocation2 + $0xa0] sm:$0xff] %v2057_v32  ;;  %1144 = vst [vmem:[#allocation2 + $0xf8] sm:$0xff] %v2057_v32 }
 0x1d2   : > { %1145 = vst [vmem:[#allocation2 + $0x20] sm:$0xff] %v2057_v32  ;;  %1146 = vst [vmem:[#allocation2 + $0x98] sm:$0xff] %v2057_v32 }
 0x1d3 PF: > { %v1245_v33 = vld [vmem:[%s2496_s6 + $0xf8] sm:$0xff]  ;;  %v1244_v34 = vld [vmem:[%s2496_s6 + $0xf0] sm:$0xff]  ;;  %v1243_v35 = vld [vmem:[%s2496_s6 + $0xe8] sm:$0xff]  ;;  %p1741_p1 = scmp.ne.s32.totalorder %s2036_s17, 1 }
 0x1d4   : > { %1278 = vmatprep.subr.mxu0 %v1245_v33  ;;  %1756 = vmatprep.subr.mxu1 %v1245_v33  ;;  %v1242_v36 = vld [vmem:[%s2496_s6 + $0xe0] sm:$0xff]  ;;  %v1241_v37 = vld [vmem:[%s2496_s6 + $0xd8] sm:$0xff]  ;;  %v1240_v38 = vld [vmem:[%s2496_s6 + $0xd0] sm:$0xff] }
 0x1d5   : > { %1279 = vmatpush1.msra.mxu0 %v1244_v34  ;;  %1788 = vmatpush1.msra.mxu1 %v1244_v34  ;;  %v1239_v39 = vld [vmem:[%s2496_s6 + $0xc8] sm:$0xff]  ;;  %v1238_v40 = vld [vmem:[%s2496_s6 + $0xc0] sm:$0xff]  ;;  %v1237_v41 = vld [vmem:[%s2496_s6 + $0xb8] sm:$0xff] }
 0x1d6   : > { %1280 = vmatprep.subr.mxu0 %v1243_v35  ;;  %1757 = vmatprep.subr.mxu1 %v1243_v35  ;;  %v1236_v42 = vld [vmem:[%s2496_s6 + $0xb0] sm:$0xff]  ;;  %v1235_v43 = vld [vmem:[%s2496_s6 + $0xa8] sm:$0xff]  ;;  %v1234_v44 = vld [vmem:[%s2496_s6 + $0xa0] sm:$0xff] }
 0x1d7   : > { %1281 = vmatpush1.msra.mxu0 %v1242_v36  ;;  %1789 = vmatpush1.msra.mxu1 %v1242_v36  ;;  %v1233_v45 = vld [vmem:[%s2496_s6 + $0x98] sm:$0xff]  ;;  %v1232_v46 = vld [vmem:[%s2496_s6 + $0x90] sm:$0xff]  ;;  %v1231_v47 = vld [vmem:[%s2496_s6 + $0x88] sm:$0xff] }
 0x1d8   : > { %1282 = vmatprep.subr.mxu0 %v1241_v37  ;;  %1758 = vmatprep.subr.mxu1 %v1241_v37  ;;  %v1230_v48 = vld [vmem:[%s2496_s6 + $0x80] sm:$0xff]  ;;  %v1229_v49 = vld [vmem:[%s2496_s6 + $0x78] sm:$0xff]  ;;  %v1228_v50 = vld [vmem:[%s2496_s6 + $0x70] sm:$0xff] }
 0x1d9   : > { %1283 = vmatpush1.msra.mxu0 %v1240_v38  ;;  %1790 = vmatpush1.msra.mxu1 %v1240_v38  ;;  %v1227_v51 = vld [vmem:[%s2496_s6 + $0x68] sm:$0xff]  ;;  %v1226_v52 = vld [vmem:[%s2496_s6 + $0x60] sm:$0xff]  ;;  %v1225_v53 = vld [vmem:[%s2496_s6 + $0x58] sm:$0xff] }
 0x1da   : > { %1284 = vmatprep.subr.mxu0 %v1239_v39  ;;  %1759 = vmatprep.subr.mxu1 %v1239_v39  ;;  %v1224_v54 = vld [vmem:[%s2496_s6 + $0x50] sm:$0xff]  ;;  %v1223_v55 = vld [vmem:[%s2496_s6 + $0x48] sm:$0xff]  ;;  %v1222_v56 = vld [vmem:[%s2496_s6 + $0x40] sm:$0xff] }
 0x1db   : > { %1285 = vmatpush1.msra.mxu0 %v1238_v40  ;;  %1791 = vmatpush1.msra.mxu1 %v1238_v40  ;;  %v1221_v57 = vld [vmem:[%s2496_s6 + $0x38] sm:$0xff]  ;;  %v1220_v58 = vld [vmem:[%s2496_s6 + $0x30] sm:$0xff]  ;;  %v1219_v59 = vld [vmem:[%s2496_s6 + $0x28] sm:$0xff] }
 0x1dc   : > { %1286 = vmatprep.subr.mxu0 %v1237_v41  ;;  %1760 = vmatprep.subr.mxu1 %v1237_v41  ;;  %v1218_v60 = vld [vmem:[%s2496_s6 + $0x20] sm:$0xff]  ;;  %v1217_v61 = vld [vmem:[%s2496_s6 + $0x18] sm:$0xff]  ;;  %v1216_v62 = vld [vmem:[%s2496_s6 + $0x10] sm:$0xff] }
 0x1dd   : > { %1287 = vmatpush1.msra.mxu0 %v1236_v42  ;;  %1792 = vmatpush1.msra.mxu1 %v1236_v42  ;;  %v1215_v63 = vld [vmem:[%s2496_s6 + $0x8] sm:$0xff]  ;;  %v1214_v0 = vld [vmem:[%s2496_s6] sm:$0xff]  ;;  %v1277_v1 = vld [vmem:[%s2496_s6 + $0x1f8] sm:$0xff] }
 0x1de   : > { %1288 = vmatprep.subr.mxu0 %v1235_v43  ;;  %1761 = vmatprep.subr.mxu1 %v1235_v43  ;;  %v1276_v2 = vld [vmem:[%s2496_s6 + $0x1f0] sm:$0xff]  ;;  %v1275_v3 = vld [vmem:[%s2496_s6 + $0x1e8] sm:$0xff]  ;;  %v1274_v4 = vld [vmem:[%s2496_s6 + $0x1e0] sm:$0xff] }
 0x1df   : > { %1289 = vmatpush1.msra.mxu0 %v1234_v44  ;;  %1793 = vmatpush1.msra.mxu1 %v1234_v44  ;;  %v1273_v5 = vld [vmem:[%s2496_s6 + $0x1d8] sm:$0xff]  ;;  %v1272_v6 = vld [vmem:[%s2496_s6 + $0x1d0] sm:$0xff]  ;;  %v1271_v7 = vld [vmem:[%s2496_s6 + $0x1c8] sm:$0xff] }
 0x1e0   : > { %1290 = vmatprep.subr.mxu0 %v1233_v45  ;;  %1762 = vmatprep.subr.mxu1 %v1233_v45  ;;  %v1270_v8 = vld [vmem:[%s2496_s6 + $0x1c0] sm:$0xff]  ;;  %v1269_v9 = vld [vmem:[%s2496_s6 + $0x1b8] sm:$0xff]  ;;  %v1268_v10 = vld [vmem:[%s2496_s6 + $0x1b0] sm:$0xff] }
 0x1e1   : > { %1291 = vmatpush1.msra.mxu0 %v1232_v46  ;;  %1794 = vmatpush1.msra.mxu1 %v1232_v46  ;;  %v1267_v11 = vld [vmem:[%s2496_s6 + $0x1a8] sm:$0xff]  ;;  %v1266_v12 = vld [vmem:[%s2496_s6 + $0x1a0] sm:$0xff]  ;;  %v1265_v13 = vld [vmem:[%s2496_s6 + $0x198] sm:$0xff] }
 0x1e2   : > { %1292 = vmatprep.subr.mxu0 %v1231_v47  ;;  %1763 = vmatprep.subr.mxu1 %v1231_v47  ;;  %v1264_v14 = vld [vmem:[%s2496_s6 + $0x190] sm:$0xff]  ;;  %v1263_v15 = vld [vmem:[%s2496_s6 + $0x188] sm:$0xff]  ;;  %v1262_v16 = vld [vmem:[%s2496_s6 + $0x180] sm:$0xff] }
 0x1e3   : > { %1293 = vmatpush1.msra.mxu0 %v1230_v48  ;;  %1795 = vmatpush1.msra.mxu1 %v1230_v48  ;;  %v1261_v17 = vld [vmem:[%s2496_s6 + $0x178] sm:$0xff]  ;;  %v1260_v18 = vld [vmem:[%s2496_s6 + $0x170] sm:$0xff]  ;;  %v1259_v19 = vld [vmem:[%s2496_s6 + $0x168] sm:$0xff] }
 0x1e4   : > { %1294 = vmatprep.subr.mxu0 %v1229_v49  ;;  %1764 = vmatprep.subr.mxu1 %v1229_v49  ;;  %v1258_v20 = vld [vmem:[%s2496_s6 + $0x160] sm:$0xff]  ;;  %v1257_v21 = vld [vmem:[%s2496_s6 + $0x158] sm:$0xff]  ;;  %v1256_v22 = vld [vmem:[%s2496_s6 + $0x150] sm:$0xff] }
 0x1e5   : > { %1295 = vmatpush1.msra.mxu0 %v1228_v50  ;;  %1796 = vmatpush1.msra.mxu1 %v1228_v50  ;;  %v1255_v23 = vld [vmem:[%s2496_s6 + $0x148] sm:$0xff]  ;;  %v1254_v24 = vld [vmem:[%s2496_s6 + $0x140] sm:$0xff]  ;;  %v1253_v25 = vld [vmem:[%s2496_s6 + $0x138] sm:$0xff] }
 0x1e6   : > { %1296 = vmatprep.subr.mxu0 %v1227_v51  ;;  %1765 = vmatprep.subr.mxu1 %v1227_v51  ;;  %v1252_v26 = vld [vmem:[%s2496_s6 + $0x130] sm:$0xff]  ;;  %v1251_v27 = vld [vmem:[%s2496_s6 + $0x128] sm:$0xff]  ;;  %v1250_v28 = vld [vmem:[%s2496_s6 + $0x120] sm:$0xff] }
 0x1e7   : > { %1297 = vmatpush1.msra.mxu0 %v1226_v52  ;;  %1797 = vmatpush1.msra.mxu1 %v1226_v52  ;;  %v1249_v29 = vld [vmem:[%s2496_s6 + $0x118] sm:$0xff]  ;;  %v1248_v30 = vld [vmem:[%s2496_s6 + $0x110] sm:$0xff]  ;;  %v1247_v31 = vld [vmem:[%s2496_s6 + $0x108] sm:$0xff] }
 0x1e8   : > { %1298 = vmatprep.subr.mxu0 %v1225_v53  ;;  %1766 = vmatprep.subr.mxu1 %v1225_v53  ;;  %v1246_v32 = vld [vmem:[%s2496_s6 + $0x100] sm:$0xff]  ;;  %v1183_v33 = vld [vmem:[%s2688_s4 + $0x8] sm:$0xff]  ;;  %v1185_v37 = vld [vmem:[%s2688_s4 + $0x18] sm:$0xff] }
 0x1e9   : > { %1299 = vmatpush1.msra.mxu0 %v1224_v54  ;;  %1798 = vmatpush1.msra.mxu1 %v1224_v54  ;;  %v1199_v34 = vld [vmem:[%s2688_s4 + $0x88] sm:$0xff]  ;;  %v1182_v35 = vld [vmem:[%s2688_s4] sm:$0xff]  ;;  %v1201_v38 = vld [vmem:[%s2688_s4 + $0x98] sm:$0xff] }
 0x1ea   : > { %1300 = vmatprep.subr.mxu0 %v1223_v55  ;;  %1767 = vmatprep.subr.mxu1 %v1223_v55  ;;  %v1198_v36 = vld [vmem:[%s2688_s4 + $0x80] sm:$0xff]  ;;  %v1184_v39 = vld [vmem:[%s2688_s4 + $0x10] sm:$0xff]  ;;  %v1187_v41 = vld [vmem:[%s2688_s4 + $0x28] sm:$0xff] }
 0x1eb   : > { %1301 = vmatpush1.msra.mxu0 %v1222_v56  ;;  %1799 = vmatpush1.msra.mxu1 %v1222_v56  ;;  %v1200_v40 = vld [vmem:[%s2688_s4 + $0x90] sm:$0xff]  ;;  %v1203_v42 = vld [vmem:[%s2688_s4 + $0xa8] sm:$0xff]  ;;  %v1186_v43 = vld [vmem:[%s2688_s4 + $0x20] sm:$0xff] }
 0x1ec   : > { %1302 = vmatprep.subr.mxu0 %v1221_v57  ;;  %1768 = vmatprep.subr.mxu1 %v1221_v57  ;;  %v1202_v44 = vld [vmem:[%s2688_s4 + $0xa0] sm:$0xff]  ;;  %v1189_v45 = vld [vmem:[%s2688_s4 + $0x38] sm:$0xff]  ;;  %v1188_v47 = vld [vmem:[%s2688_s4 + $0x30] sm:$0xff] }
 0x1ed   : > { %1303 = vmatpush1.msra.mxu0 %v1220_v58  ;;  %1800 = vmatpush1.msra.mxu1 %v1220_v58  ;;  %v1205_v46 = vld [vmem:[%s2688_s4 + $0xb8] sm:$0xff]  ;;  %v1204_v48 = vld [vmem:[%s2688_s4 + $0xb0] sm:$0xff]  ;;  %v1191_v49 = vld [vmem:[%s2688_s4 + $0x48] sm:$0xff] }
 0x1ee   : > { %1304 = vmatprep.subr.mxu0 %v1219_v59  ;;  %1769 = vmatprep.subr.mxu1 %v1219_v59  ;;  %v1207_v50 = vld [vmem:[%s2688_s4 + $0xc8] sm:$0xff]  ;;  %v1190_v51 = vld [vmem:[%s2688_s4 + $0x40] sm:$0xff]  ;;  %v1193_v53 = vld [vmem:[%s2688_s4 + $0x58] sm:$0xff] }
 0x1ef   : > { %1305 = vmatpush1.msra.mxu0 %v1218_v60  ;;  %1801 = vmatpush1.msra.mxu1 %v1218_v60  ;;  %v1206_v52 = vld [vmem:[%s2688_s4 + $0xc0] sm:$0xff]  ;;  %v1209_v54 = vld [vmem:[%s2688_s4 + $0xd8] sm:$0xff]  ;;  %v1192_v55 = vld [vmem:[%s2688_s4 + $0x50] sm:$0xff] }
 0x1f0   : > { %1306 = vmatprep.subr.mxu0 %v1217_v61  ;;  %1770 = vmatprep.subr.mxu1 %v1217_v61  ;;  %v1208_v56 = vld [vmem:[%s2688_s4 + $0xd0] sm:$0xff]  ;;  %v1195_v57 = vld [vmem:[%s2688_s4 + $0x68] sm:$0xff]  ;;  %v1194_v59 = vld [vmem:[%s2688_s4 + $0x60] sm:$0xff] }
 0x1f1   : > { %1307 = vmatpush1.msra.mxu0 %v1216_v62  ;;  %1802 = vmatpush1.msra.mxu1 %v1216_v62  ;;  %v1211_v58 = vld [vmem:[%s2688_s4 + $0xe8] sm:$0xff]  ;;  %v1210_v60 = vld [vmem:[%s2688_s4 + $0xe0] sm:$0xff]  ;;  %v1197_v61 = vld [vmem:[%s2688_s4 + $0x78] sm:$0xff] }
 0x1f2   : > { %1308 = vmatprep.subr.mxu0 %v1215_v63  ;;  %1771 = vmatprep.subr.mxu1 %v1215_v63  ;;  %v1213_v62 = vld [vmem:[%s2688_s4 + $0xf8] sm:$0xff]  ;;  %v1196_v63 = vld [vmem:[%s2688_s4 + $0x70] sm:$0xff] }
 0x1f3   : > { %1309 = vmatpush1.msra.mxu0 %v1214_v0  ;;  %1803 = vmatpush1.msra.mxu1 %v1214_v0  ;;  %v1212_v0 = vld [vmem:[%s2688_s4 + $0xf0] sm:$0xff] }
 0x1f4   : > { %1310 = vmatprep.subr.mxu0 %v1277_v1  ;;  %1772 = vmatprep.subr.mxu1 %v1277_v1  ;;  %v1147_v1 = vld [vmem:[#allocation2 + $0xb0] sm:$0xff] }
 0x1f5   : > { %1311 = vmatpush2.msra.mxu0 %v1276_v2  ;;  %1804 = vmatpush2.msra.mxu1 %v1276_v2  ;;  %v1163_v2 = vld [vmem:[#allocation2 + $0x38] sm:$0xff] }
 0x1f6   : > { %1312 = vmatprep.subr.mxu0 %v1275_v3  ;;  %1773 = vmatprep.subr.mxu1 %v1275_v3 }
 0x1f7   : > { %1313 = vmatpush2.msra.mxu0 %v1274_v4  ;;  %1805 = vmatpush2.msra.mxu1 %v1274_v4 }
 0x1f8   : > { %1314 = vmatprep.subr.mxu0 %v1273_v5  ;;  %1774 = vmatprep.subr.mxu1 %v1273_v5  ;;  %v1148_v5 = vld [vmem:[#allocation2] sm:$0xff] }
 0x1f9   : > { %1315 = vmatpush2.msra.mxu0 %v1272_v6  ;;  %1806 = vmatpush2.msra.mxu1 %v1272_v6  ;;  %v1164_v6 = vld [vmem:[#allocation2 + $0x58] sm:$0xff] }
 0x1fa   : > { %1316 = vmatprep.subr.mxu0 %v1271_v7  ;;  %1775 = vmatprep.subr.mxu1 %v1271_v7 }
 0x1fb   : > { %1317 = vmatpush2.msra.mxu0 %v1270_v8  ;;  %1807 = vmatpush2.msra.mxu1 %v1270_v8 }
 0x1fc   : > { %1318 = vmatprep.subr.mxu0 %v1269_v9  ;;  %1776 = vmatprep.subr.mxu1 %v1269_v9 }
 0x1fd   : > { %1319 = vmatpush2.msra.mxu0 %v1268_v10  ;;  %1808 = vmatpush2.msra.mxu1 %v1268_v10 }
 0x1fe   : > { %1320 = vmatprep.subr.mxu0 %v1267_v11  ;;  %1777 = vmatprep.subr.mxu1 %v1267_v11  ;;  %v1149_v11 = vld [vmem:[#allocation2 + $0xd8] sm:$0xff] }
 0x1ff   : > { %1321 = vmatpush2.msra.mxu0 %v1266_v12  ;;  %1809 = vmatpush2.msra.mxu1 %v1266_v12  ;;  %v1165_v12 = vld [vmem:[#allocation2 + $0x40] sm:$0xff] }
 0x200   : > { %1322 = vmatprep.subr.mxu0 %v1265_v13  ;;  %1778 = vmatprep.subr.mxu1 %v1265_v13 }
 0x201   : > { %1323 = vmatpush2.msra.mxu0 %v1264_v14  ;;  %1810 = vmatpush2.msra.mxu1 %v1264_v14 }
 0x202   : > { %1324 = vmatprep.subr.mxu0 %v1263_v15  ;;  %1779 = vmatprep.subr.mxu1 %v1263_v15 }
 0x203   : > { %1325 = vmatpush2.msra.mxu0 %v1262_v16  ;;  %1811 = vmatpush2.msra.mxu1 %v1262_v16 }
 0x204   : > { %1326 = vmatprep.subr.mxu0 %v1261_v17  ;;  %1780 = vmatprep.subr.mxu1 %v1261_v17  ;;  %v1150_v17 = vld [vmem:[#allocation2 + $0x18] sm:$0xff] }
 0x205   : > { %1327 = vmatpush2.msra.mxu0 %v1260_v18  ;;  %1812 = vmatpush2.msra.mxu1 %v1260_v18  ;;  %v1166_v18 = vld [vmem:[#allocation2 + $0xc8] sm:$0xff] }
 0x206   : > { %1328 = vmatprep.subr.mxu0 %v1259_v19  ;;  %1781 = vmatprep.subr.mxu1 %v1259_v19 }
 0x207   : > { %1329 = vmatpush2.msra.mxu0 %v1258_v20  ;;  %1813 = vmatpush2.msra.mxu1 %v1258_v20 }
 0x208   : > { %1330 = vmatprep.subr.mxu0 %v1257_v21  ;;  %1782 = vmatprep.subr.mxu1 %v1257_v21 }
 0x209   : > { %1331 = vmatpush2.msra.mxu0 %v1256_v22  ;;  %1814 = vmatpush2.msra.mxu1 %v1256_v22 }
 0x20a   : > { %1332 = vmatprep.subr.mxu0 %v1255_v23  ;;  %1783 = vmatprep.subr.mxu1 %v1255_v23  ;;  %v1151_v23 = vld [vmem:[#allocation2 + $0x50] sm:$0xff] }
 0x20b   : > { %1333 = vmatpush2.msra.mxu0 %v1254_v24  ;;  %1815 = vmatpush2.msra.mxu1 %v1254_v24  ;;  %v1167_v24 = vld [vmem:[#allocation2 + $0xe0] sm:$0xff] }
 0x20c   : > { %1334 = vmatprep.subr.mxu0 %v1253_v25  ;;  %1784 = vmatprep.subr.mxu1 %v1253_v25 }
 0x20d   : > { %1335 = vmatpush2.msra.mxu0 %v1252_v26  ;;  %1816 = vmatpush2.msra.mxu1 %v1252_v26 }
 0x20e   : > { %1336 = vmatprep.subr.mxu0 %v1251_v27  ;;  %1785 = vmatprep.subr.mxu1 %v1251_v27 }
 0x20f   : > { %1337 = vmatpush2.msra.mxu0 %v1250_v28  ;;  %1817 = vmatpush2.msra.mxu1 %v1250_v28 }
 0x210   : > { %1338 = vmatprep.subr.mxu0 %v1249_v29  ;;  %1786 = vmatprep.subr.mxu1 %v1249_v29  ;;  %v1152_v29 = vld [vmem:[#allocation2 + $0x68] sm:$0xff] }
 0x211   : > { %1339 = vmatpush2.msra.mxu0 %v1248_v30  ;;  %1818 = vmatpush2.msra.mxu1 %v1248_v30  ;;  %v1168_v30 = vld [vmem:[#allocation2 + $0x90] sm:$0xff] }
 0x212   : > { %1340 = vmatprep.subr.mxu0 %v1247_v31  ;;  %1787 = vmatprep.subr.mxu1 %v1247_v31 }
 0x213   : > { %1341 = vmatpush2.msra.mxu0 %v1246_v32  ;;  %1819 = vmatpush2.msra.mxu1 %v1246_v32 }
 0x214   : > { %1342 = vmatprep.mubr.f32.mxu0 %v1183_v33  ;;  %1390 = vmatprep.mubr.f32.mxu1 %v1199_v34 }
 0x215   : > { %1343 = vmatmul.mubr.f32.vlgmr.msra.gmra.mxu0 %v1182_v35  ;;  %1391 = vmatmul.mubr.f32.vlgmr.msra.gmra.mxu1 %v1198_v36  ;;  %v1153_v35 = vld [vmem:[#allocation2 + $0x30] sm:$0xff] }
 0x216   : > { %1348 = vmatprep.mubr.f32.mxu0 %v1185_v37  ;;  %1396 = vmatprep.mubr.f32.mxu1 %v1201_v38  ;;  %v1169_v36 = vld [vmem:[#allocation2 + $0x70] sm:$0xff] }
 0x219   : > { %1349 = vmatmul.mubr.f32.gmra.mxu0 %v1184_v39  ;;  %1397 = vmatmul.mubr.f32.gmra.mxu1 %v1200_v40 }
 0x21a   : > { %1354 = vmatprep.mubr.f32.mxu0 %v1187_v41  ;;  %1402 = vmatprep.mubr.f32.mxu1 %v1203_v42  ;;  %v1154_v41 = vld [vmem:[#allocation2 + $0x48] sm:$0xff]  ;;  %v1170_v42 = vld [vmem:[#allocation2 + $0xc0] sm:$0xff] }
 0x21d   : > { %1355 = vmatmul.mubr.f32.gmra.mxu0 %v1186_v43  ;;  %1403 = vmatmul.mubr.f32.gmra.mxu1 %v1202_v44 }
 0x21e   : > { %1360 = vmatprep.mubr.f32.mxu0 %v1189_v45  ;;  %1408 = vmatprep.mubr.f32.mxu1 %v1205_v46 }
 0x221   : > { %1361 = vmatmul.mubr.f32.gmra.mxu0 %v1188_v47  ;;  %1409 = vmatmul.mubr.f32.gmra.mxu1 %v1204_v48  ;;  %v1155_v47 = vld [vmem:[#allocation2 + $0x80] sm:$0xff]  ;;  %v1171_v48 = vld [vmem:[#allocation2 + $0xa8] sm:$0xff] }
 0x222   : > { %1366 = vmatprep.mubr.f32.mxu0 %v1191_v49  ;;  %1414 = vmatprep.mubr.f32.mxu1 %v1207_v50 }
 0x225   : > { %1367 = vmatmul.mubr.f32.gmra.mxu0 %v1190_v51  ;;  %1415 = vmatmul.mubr.f32.gmra.mxu1 %v1206_v52 }
 0x226   : > { %1372 = vmatprep.mubr.f32.mxu0 %v1193_v53  ;;  %1420 = vmatprep.mubr.f32.mxu1 %v1209_v54  ;;  %v1156_v53 = vld [vmem:[#allocation2 + $0x88] sm:$0xff]  ;;  %v1172_v54 = vld [vmem:[#allocation2 + $0xd0] sm:$0xff] }
 0x229   : > { %1373 = vmatmul.mubr.f32.gmra.mxu0 %v1192_v55  ;;  %1421 = vmatmul.mubr.f32.gmra.mxu1 %v1208_v56 }
 0x22a   : > { %1378 = vmatprep.mubr.f32.mxu0 %v1195_v57  ;;  %1426 = vmatprep.mubr.f32.mxu1 %v1211_v58 }
 0x22d   : > { %1379 = vmatmul.mubr.f32.gmra.mxu0 %v1194_v59  ;;  %1427 = vmatmul.mubr.f32.gmra.mxu1 %v1210_v60  ;;  %v1157_v59 = vld [vmem:[#allocation2 + $0xe8] sm:$0xff]  ;;  %v1173_v60 = vld [vmem:[#allocation2 + $0x10] sm:$0xff] }
 0x22e   : > { %1384 = vmatprep.mubr.f32.mxu0 %v1197_v61  ;;  %1432 = vmatprep.mubr.f32.mxu1 %v1213_v62 }
 0x231   : > { %1385 = vmatmul.mubr.f32.gmra.mxu0 %v1196_v63  ;;  %1433 = vmatmul.mubr.f32.gmra.mxu1 %v1212_v0 }
 0x2d5   : > { %v1344_v3 = vpop.f32.mrf.mxu0  ;;  %v1392_v4 = vpop.f32.mrf.mxu1 }
 0x2d6   : > { %v1439_v7 = vadd.f32 %v1344_v3, %v1147_v1  ;;  %v1455_v8 = vadd.f32 %v1392_v4, %v1163_v2  ;;  %v1158_v1 = vld [vmem:[#allocation2 + $0xb8] sm:$0xff]  ;;  %v1174_v2 = vld [vmem:[#allocation2 + $0x28] sm:$0xff] }
 0x2d7   : > { %v1346_v9 = vpop.f32.mrf.mxu0  ;;  %v1394_v10 = vpop.f32.mrf.mxu1 }
 0x2d8   : > { %1471 = vst [vmem:[#allocation2 + $0xb0] sm:$0xff] %v1439_v7  ;;  %1487 = vst [vmem:[#allocation2 + $0x38] sm:$0xff] %v1455_v8  ;;  %v1440_v13 = vadd.f32 %v1346_v9, %v1148_v5  ;;  %v1456_v14 = vadd.f32 %v1394_v10, %v1164_v6  ;;  %v1159_v7 = vld [vmem:[#allocation2 + $0x60] sm:$0xff] }
 0x2d9   : > { %v1350_v15 = vpop.f32.mrf.mxu0  ;;  %v1398_v16 = vpop.f32.mrf.mxu1  ;;  %v1175_v8 = vld [vmem:[#allocation2 + $0xa0] sm:$0xff] }
 0x2da   : > { %1472 = vst [vmem:[#allocation2] sm:$0xff] %v1440_v13  ;;  %1488 = vst [vmem:[#allocation2 + $0x58] sm:$0xff] %v1456_v14  ;;  %v1441_v19 = vadd.f32 %v1350_v15, %v1149_v11  ;;  %v1457_v20 = vadd.f32 %v1398_v16, %v1165_v12  ;;  %v1160_v13 = vld [vmem:[#allocation2 + $0xf0] sm:$0xff]  ;;  %v1176_v14 = vld [vmem:[#allocation2 + $0xf8] sm:$0xff] }
 0x2db   : > { %v1352_v21 = vpop.f32.mrf.mxu0  ;;  %v1400_v22 = vpop.f32.mrf.mxu1 }
 0x2dc   : > { %1473 = vst [vmem:[#allocation2 + $0xd8] sm:$0xff] %v1441_v19  ;;  %1489 = vst [vmem:[#allocation2 + $0x40] sm:$0xff] %v1457_v20  ;;  %v1442_v25 = vadd.f32 %v1352_v21, %v1150_v17  ;;  %v1458_v26 = vadd.f32 %v1400_v22, %v1166_v18  ;;  %v1161_v19 = vld [vmem:[#allocation2 + $0x8] sm:$0xff]  ;;  %v1177_v20 = vld [vmem:[#allocation2 + $0x20] sm:$0xff] }
 0x2dd   : > { %v1356_v27 = vpop.f32.mrf.mxu0  ;;  %v1404_v28 = vpop.f32.mrf.mxu1 }
 0x2de   : > { %1474 = vst [vmem:[#allocation2 + $0x18] sm:$0xff] %v1442_v25  ;;  %1490 = vst [vmem:[#allocation2 + $0xc8] sm:$0xff] %v1458_v26  ;;  %v1443_v31 = vadd.f32 %v1356_v27, %v1151_v23  ;;  %v1459_v32 = vadd.f32 %v1404_v28, %v1167_v24  ;;  %v1162_v25 = vld [vmem:[#allocation2 + $0x78] sm:$0xff] }
 0x2df   : > { %v1358_v33 = vpop.f32.mrf.mxu0  ;;  %v1406_v34 = vpop.f32.mrf.mxu1  ;;  %v1178_v26 = vld [vmem:[#allocation2 + $0x98] sm:$0xff] }
 0x2e0   : > { %1475 = vst [vmem:[#allocation2 + $0x50] sm:$0xff] %v1443_v31  ;;  %1491 = vst [vmem:[#allocation2 + $0xe0] sm:$0xff] %v1459_v32  ;;  %v1444_v37 = vadd.f32 %v1358_v33, %v1152_v29  ;;  %v1460_v38 = vadd.f32 %v1406_v34, %v1168_v30 }
 0x2e1   : > { %v1362_v39 = vpop.f32.mrf.mxu0  ;;  %v1410_v40 = vpop.f32.mrf.mxu1 }
 0x2e2   : > { %1476 = vst [vmem:[#allocation2 + $0x68] sm:$0xff] %v1444_v37  ;;  %1492 = vst [vmem:[#allocation2 + $0x90] sm:$0xff] %v1460_v38  ;;  %v1445_v43 = vadd.f32 %v1362_v39, %v1153_v35  ;;  %v1461_v44 = vadd.f32 %v1410_v40, %v1169_v36 }
 0x2e3   : > { %v1364_v45 = vpop.f32.mrf.mxu0  ;;  %v1412_v46 = vpop.f32.mrf.mxu1 }
 0x2e4   : > { %1477 = vst [vmem:[#allocation2 + $0x30] sm:$0xff] %v1445_v43  ;;  %1493 = vst [vmem:[#allocation2 + $0x70] sm:$0xff] %v1461_v44  ;;  %v1446_v49 = vadd.f32 %v1364_v45, %v1154_v41  ;;  %v1462_v50 = vadd.f32 %v1412_v46, %v1170_v42 }
 0x2e5   : > { %v1368_v51 = vpop.f32.mrf.mxu0  ;;  %v1416_v52 = vpop.f32.mrf.mxu1 }
 0x2e6   : > { %1478 = vst [vmem:[#allocation2 + $0x48] sm:$0xff] %v1446_v49  ;;  %1494 = vst [vmem:[#allocation2 + $0xc0] sm:$0xff] %v1462_v50  ;;  %v1447_v55 = vadd.f32 %v1368_v51, %v1155_v47  ;;  %v1463_v56 = vadd.f32 %v1416_v52, %v1171_v48 }
 0x2e7   : > { %v1370_v57 = vpop.f32.mrf.mxu0  ;;  %v1418_v58 = vpop.f32.mrf.mxu1 }
 0x2e8   : > { %1479 = vst [vmem:[#allocation2 + $0x80] sm:$0xff] %v1447_v55  ;;  %1495 = vst [vmem:[#allocation2 + $0xa8] sm:$0xff] %v1463_v56  ;;  %v1448_v61 = vadd.f32 %v1370_v57, %v1156_v53  ;;  %v1464_v62 = vadd.f32 %v1418_v58, %v1172_v54 }
 0x2e9   : > { %v1374_v63 = vpop.f32.mrf.mxu0  ;;  %v1422_v0 = vpop.f32.mrf.mxu1 }
 0x2ea   : > { %1480 = vst [vmem:[#allocation2 + $0x88] sm:$0xff] %v1448_v61  ;;  %1496 = vst [vmem:[#allocation2 + $0xd0] sm:$0xff] %v1464_v62  ;;  %v1449_v3 = vadd.f32 %v1374_v63, %v1157_v59  ;;  %v1465_v4 = vadd.f32 %v1422_v0, %v1173_v60 }
 0x2eb   : > { %v1376_v5 = vpop.f32.mrf.mxu0  ;;  %v1424_v6 = vpop.f32.mrf.mxu1 }
 0x2ec   : > { %1481 = vst [vmem:[#allocation2 + $0xe8] sm:$0xff] %v1449_v3  ;;  %1497 = vst [vmem:[#allocation2 + $0x10] sm:$0xff] %v1465_v4  ;;  %v1450_v9 = vadd.f32 %v1376_v5, %v1158_v1  ;;  %v1466_v10 = vadd.f32 %v1424_v6, %v1174_v2 }
 0x2ed   : > { %v1380_v11 = vpop.f32.mrf.mxu0  ;;  %v1428_v12 = vpop.f32.mrf.mxu1 }
 0x2ee   : > { %1482 = vst [vmem:[#allocation2 + $0xb8] sm:$0xff] %v1450_v9  ;;  %1498 = vst [vmem:[#allocation2 + $0x28] sm:$0xff] %v1466_v10  ;;  %v1451_v15 = vadd.f32 %v1380_v11, %v1159_v7  ;;  %v1467_v16 = vadd.f32 %v1428_v12, %v1175_v8 }
 0x2ef   : > { %v1382_v17 = vpop.f32.mrf.mxu0  ;;  %v1430_v18 = vpop.f32.mrf.mxu1 }
 0x2f0   : > { %1483 = vst [vmem:[#allocation2 + $0x60] sm:$0xff] %v1451_v15  ;;  %1499 = vst [vmem:[#allocation2 + $0xa0] sm:$0xff] %v1467_v16  ;;  %v1452_v21 = vadd.f32 %v1382_v17, %v1160_v13  ;;  %v1468_v22 = vadd.f32 %v1430_v18, %v1176_v14 }
 0x2f1   : > { %v1386_v23 = vpop.f32.mrf.mxu0  ;;  %v1434_v24 = vpop.f32.mrf.mxu1 }
 0x2f2   : > { %1484 = vst [vmem:[#allocation2 + $0xf0] sm:$0xff] %v1452_v21  ;;  %1500 = vst [vmem:[#allocation2 + $0xf8] sm:$0xff] %v1468_v22  ;;  %v1453_v27 = vadd.f32 %v1386_v23, %v1161_v19  ;;  %v1469_v28 = vadd.f32 %v1434_v24, %v1177_v20  ;;  %1506 = sbr.rel (%p1741_p1) target bundleno = 776 (0x308), region = 71 }
 0x2f3   : > { %v1388_v29 = vpop.f32.mrf.mxu0  ;;  %v1436_v30 = vpop.f32.mrf.mxu1 }
 0x2f4   : > { %1485 = vst [vmem:[#allocation2 + $0x8] sm:$0xff] %v1453_v27  ;;  %1501 = vst [vmem:[#allocation2 + $0x20] sm:$0xff] %v1469_v28  ;;  %v1454_v31 = vadd.f32 %v1388_v29, %v1162_v25  ;;  %v1470_v32 = vadd.f32 %v1436_v30, %v1178_v26 }
 0x2f6   : > { %1486 = vst [vmem:[#allocation2 + $0x78] sm:$0xff] %v1454_v31  ;;  %1502 = vst [vmem:[#allocation2 + $0x98] sm:$0xff] %v1470_v32 }
 0x2f7   : > { %v1507_v33 = vld [vmem:[#allocation2 + $0xb0] sm:$0xff]  ;;  %v1508_v34 = vld [vmem:[#allocation2] sm:$0xff]  ;;  %v1509_v35 = vld [vmem:[#allocation2 + $0xd8] sm:$0xff] }
 0x2f8   : > { %1539 = vst [vmem:[%s2724_s24] sm:$0xff] %v1507_v33  ;;  %1540 = vst [vmem:[%s2724_s24 + $0x8] sm:$0xff] %v1508_v34  ;;  %v1510_v36 = vld [vmem:[#allocation2 + $0x18] sm:$0xff]  ;;  %v1511_v37 = vld [vmem:[#allocation2 + $0x50] sm:$0xff] }
 0x2f9   : > { %1541 = vst [vmem:[%s2724_s24 + $0x10] sm:$0xff] %v1509_v35  ;;  %v1512_v38 = vld [vmem:[#allocation2 + $0x68] sm:$0xff]  ;;  %1542 = vst [vmem:[%s2724_s24 + $0x18] sm:$0xff] %v1510_v36  ;;  %v1513_v39 = vld [vmem:[#allocation2 + $0x30] sm:$0xff] }
 0x2fa   : > { %1543 = vst [vmem:[%s2724_s24 + $0x20] sm:$0xff] %v1511_v37  ;;  %1544 = vst [vmem:[%s2724_s24 + $0x28] sm:$0xff] %v1512_v38  ;;  %v1514_v40 = vld [vmem:[#allocation2 + $0x48] sm:$0xff]  ;;  %v1515_v41 = vld [vmem:[#allocation2 + $0x80] sm:$0xff] }
 0x2fb   : > { %1545 = vst [vmem:[%s2724_s24 + $0x30] sm:$0xff] %v1513_v39  ;;  %1546 = vst [vmem:[%s2724_s24 + $0x38] sm:$0xff] %v1514_v40  ;;  %v1516_v42 = vld [vmem:[#allocation2 + $0x88] sm:$0xff]  ;;  %v1518_v44 = vld [vmem:[#allocation2 + $0xb8] sm:$0xff] }
 0x2fc   : > { %1547 = vst [vmem:[%s2724_s24 + $0x40] sm:$0xff] %v1515_v41  ;;  %v1517_v43 = vld [vmem:[#allocation2 + $0xe8] sm:$0xff]  ;;  %1548 = vst [vmem:[%s2724_s24 + $0x48] sm:$0xff] %v1516_v42  ;;  %v1519_v45 = vld [vmem:[#allocation2 + $0x60] sm:$0xff] }
 0x2fd   : > { %1549 = vst [vmem:[%s2724_s24 + $0x50] sm:$0xff] %v1517_v43  ;;  %1550 = vst [vmem:[%s2724_s24 + $0x58] sm:$0xff] %v1518_v44  ;;  %v1520_v46 = vld [vmem:[#allocation2 + $0xf0] sm:$0xff]  ;;  %v1521_v47 = vld [vmem:[#allocation2 + $0x8] sm:$0xff] }
 0x2fe   : > { %1551 = vst [vmem:[%s2724_s24 + $0x60] sm:$0xff] %v1519_v45  ;;  %1552 = vst [vmem:[%s2724_s24 + $0x68] sm:$0xff] %v1520_v46  ;;  %v1522_v48 = vld [vmem:[#allocation2 + $0x78] sm:$0xff]  ;;  %v1525_v51 = vld [vmem:[#allocation2 + $0x40] sm:$0xff] }
 0x2ff   : > { %1553 = vst [vmem:[%s2724_s24 + $0x70] sm:$0xff] %v1521_v47  ;;  %v1523_v49 = vld [vmem:[#allocation2 + $0x38] sm:$0xff]  ;;  %1554 = vst [vmem:[%s2724_s24 + $0x78] sm:$0xff] %v1522_v48  ;;  %v1526_v52 = vld [vmem:[#allocation2 + $0xc8] sm:$0xff] }
 0x300   : > { %v1524_v50 = vld [vmem:[#allocation2 + $0x58] sm:$0xff]  ;;  %1555 = vst [vmem:[%s2724_s24 + $0x80] sm:$0xff] %v1523_v49  ;;  %v1527_v53 = vld [vmem:[#allocation2 + $0xe0] sm:$0xff]  ;;  %1557 = vst [vmem:[%s2724_s24 + $0x90] sm:$0xff] %v1525_v51 }
 0x301   : > { %1556 = vst [vmem:[%s2724_s24 + $0x88] sm:$0xff] %v1524_v50  ;;  %1558 = vst [vmem:[%s2724_s24 + $0x98] sm:$0xff] %v1526_v52  ;;  %v1528_v54 = vld [vmem:[#allocation2 + $0x90] sm:$0xff]  ;;  %v1530_v56 = vld [vmem:[#allocation2 + $0xc0] sm:$0xff] }
 0x302   : > { %1559 = vst [vmem:[%s2724_s24 + $0xa0] sm:$0xff] %v1527_v53  ;;  %v1529_v55 = vld [vmem:[#allocation2 + $0x70] sm:$0xff]  ;;  %1560 = vst [vmem:[%s2724_s24 + $0xa8] sm:$0xff] %v1528_v54  ;;  %v1531_v57 = vld [vmem:[#allocation2 + $0xa8] sm:$0xff] }
 0x303   : > { %1561 = vst [vmem:[%s2724_s24 + $0xb0] sm:$0xff] %v1529_v55  ;;  %1562 = vst [vmem:[%s2724_s24 + $0xb8] sm:$0xff] %v1530_v56  ;;  %v1532_v58 = vld [vmem:[#allocation2 + $0xd0] sm:$0xff]  ;;  %v1534_v60 = vld [vmem:[#allocation2 + $0x28] sm:$0xff] }
 0x304   : > { %v1533_v59 = vld [vmem:[#allocation2 + $0x10] sm:$0xff]  ;;  %1563 = vst [vmem:[%s2724_s24 + $0xc0] sm:$0xff] %v1531_v57  ;;  %1564 = vst [vmem:[%s2724_s24 + $0xc8] sm:$0xff] %v1532_v58  ;;  %v1535_v61 = vld [vmem:[#allocation2 + $0xa0] sm:$0xff] }
 0x305   : > { %1565 = vst [vmem:[%s2724_s24 + $0xd0] sm:$0xff] %v1533_v59  ;;  %v1536_v62 = vld [vmem:[#allocation2 + $0xf8] sm:$0xff]  ;;  %1566 = vst [vmem:[%s2724_s24 + $0xd8] sm:$0xff] %v1534_v60  ;;  %v1537_v63 = vld [vmem:[#allocation2 + $0x20] sm:$0xff] }
 0x306   : > { %1567 = vst [vmem:[%s2724_s24 + $0xe0] sm:$0xff] %v1535_v61  ;;  %1568 = vst [vmem:[%s2724_s24 + $0xe8] sm:$0xff] %v1536_v62  ;;  %v1538_v0 = vld [vmem:[#allocation2 + $0x98] sm:$0xff] }
 0x307   : > { %1569 = vst [vmem:[%s2724_s24 + $0xf0] sm:$0xff] %v1537_v63  ;;  %1570 = vst [vmem:[%s2724_s24 + $0xf8] sm:$0xff] %v1538_v0 }
 0x308 PF: > { %s1755_s17 = sshll.u32 %s2040_s18, 12  ;;  %s1588_s9 = sshll.u32 %s2724_s24, 4  ;;  %s2863_s9 = int_to_ptr.vmem [resolvable:$true] %s1588_s9 }
 0x309   : > { %s2860_s7 = scalar_lea.hbm %s2925_s3, %s1755_s17  ;;  %s1572_s29 = scalar_lea.sflag [#allocation6], %s2475_s27 }
 0x30a   : > { %s1940_s23 = scalar_lea.vmem %s2863_s9, 4096  ;;  %s2058_s26 = smov [#allocation8]  }
 0x30b   : > { %p1941_p2 = scmp.ne.s32.totalorder %s2863_s9, %s1940_s23  ;;  %s1944_s11 = sshll.u32 %s2058_s26, 4  ;;  %s1945_s11 = int_to_ptr.vmem [resolvable:$false] %s1944_s11 }
 0x30c   : > { %s1946_s18 = scalar_lea.vmem %s1945_s11, 8192  ;;  %p1947_p9 = scmp.lt.s32.totalorder %s2863_s9, %s1945_s11 }
 0x30d   : > { %p1942_p4 = pnand %p1941_p2, %p2184_p13  ;;  %p1948_p10 = scmp.lt.s32.totalorder %s1946_s18, %s1940_s23 }
 0x30f   : > { %p1943_p8 = pneg %p1942_p4  ;;  %p1949_p11 = por %p1948_p10, %p1947_p9 }
 0x311   : > { %p1950_p3 = pnand %p1949_p11, %p1943_p8 }
 0x313   : > { %1953 = shalt.err (!%p1950_p3)
}
 0x314   : > { %s1954_s10 = scalar_lea.hbm %s2860_s7, 4096  ;;  %s1958_s30 = scalar_lea.hbm %s2925_s3, 8192 }
 0x315   : > { %p1955_p12 = scmp.ne.s32.totalorder %s2860_s7, %s1954_s10  ;;  %p1959_p7 = scmp.lt.s32.totalorder %s2860_s7, %s2925_s3 }
 0x316   : > { %p1960_p1 = scmp.lt.s32.totalorder %s1958_s30, %s1954_s10 }
 0x317   : > { %p1956_p0 = pnand %p1955_p12, %p2184_p13 }
 0x318   : > { %p1961_p2 = por %p1960_p1, %p1959_p7 }
 0x319   : > { %p1957_p6 = pneg %p1956_p0 }
 0x31b   : > { %p1962_p4 = pnand %p1961_p2, %p1957_p6 }
 0x31d   : > { %1965 = shalt.err (!%p1962_p4)
}
 0x31e   : > { %s2059_s4 = smov 256   ;;  %s2060_s24 = smov 16  }
 0x31f   : > { %1822 = dma.vmem_to_hbm [thread:$0]  (%p2184_p13), %s2863_s9, 4096, %s2860_s7, %s1572_s29, %s2059_s4, %s2059_s4, %s2060_s24  }
 0x320 PF: > { %p1828_p8 = scmp.ge.s32.totalorder %s2052_s21, 2  ;;  %s1603_s25 = sand.u32 1, %s2024_s14  }
 0x321   : > { %s1604_s5 = scalar_lea.sflag [#allocation6], %s1603_s25 }
 0x322   : > { %p1825_p9 = pnand %p1828_p8, %p2191_p5 }
 0x324   : > { %p1826_p10 = pneg %p1825_p9 }
 0x326   : > { %2011 = dma.done.wait (%p1826_p10), %s1604_s5, 4096  }
 0x327   : > { %2013 = vsyncadd (%p1826_p10), %s1604_s5, 4294963200  ;;  %s19_s21 = sadd.s32 1, %s2052_s21   ;;  %s2940_s23 = sld [smem:[#allocation13_spill]] }
 0x328   : > { %p16_p11 = scmp.ge.s32.totalorder %s19_s21, 6   ;;  %s2941_s8 = sld [smem:[#allocation14_spill]] }
 0x329   : > { %s2942_s27 = sld [smem:[#allocation11_spill]]  ;;  %s2944_s12 = smov %s2020_s13 }
 0x32a   : > { %s2943_s7 = sld [smem:[#allocation12_spill]]  ;;  %s2946_s14 = smov %s2028_s15 }
 0x32b   : > { %s2947_s15 = smov %s2032_s16  ;;  %s2949_s17 = smov %s2044_s19 }
 0x32c   : > { %s2950_s18 = smov %s2048_s20  ;;  %18 = sbr.rel (!%p16_p11) target bundleno = 8 (0x8), region = 125 }
 0x32d   : > { %s2945_s13 = smov %s2940_s23 }
 0x32e   : > { %s2948_s16 = smov %s2941_s8 }
 0x32f   : > { %s2951_s19 = smov %s2942_s27 }
 0x330   : > { %s2952_s20 = smov %s2943_s7 }
 0x331   :  { %1609 = vsyncpa [#allocation5], 1 }
 0x332   :  { %1611 = vsyncpa [#allocation5 + $0x1], 1 }
 0x333   :  { %1612 = vsyncpa [#allocation6], 1 }
 0x334   :  { %1614 = vsyncpa [#allocation6 + $0x1], 1 }

</bundles_post_ra>
